<compile_context>
chip_gen: v5e
topology: v5e:2x2
jax: 0.10.0
libtpu: 0.0.40
codegen_flags: <defaults>
</compile_context>

<pallas_src>
import math

import jax
import jax.numpy as jnp
from jax.experimental import pallas as pl
from jax.experimental.pallas import tpu as pltpu

LN_EPS = 1e-5                 # PyTorch nn.LayerNorm default
_INV_SQRT2 = 0.7071067811865476


def _erf(x):
    """Abramowitz & Stegun 7.1.26 erf approximation (max abs err ~1.5e-7)."""
    ax = jnp.abs(x)
    # NOTE: kept as an exact divide rather than pl.reciprocal(approx=True) so
    # the GELU stays within ~1e-6 of PyTorch's exact-erf GELU (correctness
    # guardrail; the win from moving this divide to the EUP is minor).
    t = 1.0 / (1.0 + 0.3275911 * ax)
    poly = t * (0.254829592 + t * (-0.284496736 + t * (1.421413741
               + t * (-1.453152027 + t * 1.061405429))))
    erf_abs = 1.0 - poly * jnp.exp(-ax * ax)
    return jnp.where(x >= 0.0, erf_abs, -erf_abs)


def _gelu_exact(x):
    # PyTorch default nn.GELU(): 0.5 * x * (1 + erf(x / sqrt(2)))
    return 0.5 * x * (1.0 + _erf(x * _INV_SQRT2))


def _layernorm(h, gamma, beta):
    mean = jnp.mean(h, axis=-1, keepdims=True)
    c = h - mean
    var = jnp.mean(c * c, axis=-1, keepdims=True)
    return c * jax.lax.rsqrt(var + LN_EPS) * gamma + beta


def ffn_postln_kernel(x_ref, z_ref, w1_ref, b1_ref, w2_ref, b2_ref,
                      g1_ref, be1_ref, g2_ref, be2_ref, o_ref,
                      zn_ref, acc_ref):
    k = pl.program_id(1)

    @pl.when(k == 0)
    def _init():
        # TODO(synk): nn.Dropout(p=0.1) is treated as identity (eval-mode
        #             semantics); training-mode stochastic dropout is not
        #             implemented.
        x = x_ref[...].astype(jnp.float32)
        z = z_ref[...].astype(jnp.float32)
        zn_ref[...] = _layernorm(x + z,
                                 g1_ref[...].astype(jnp.float32),
                                 be1_ref[...].astype(jnp.float32))
        acc_ref[...] = jnp.zeros_like(acc_ref)

    # FFN partial over this hidden chunk: Linear1 -> exact GELU -> Linear2.
    # MXU consumes the weights' native dtype; accumulation stays in f32.
    zn = zn_ref[...]
    h1 = jnp.dot(zn.astype(w1_ref.dtype), w1_ref[...],
                 preferred_element_type=jnp.float32)
    h1 = _gelu_exact(h1 + b1_ref[...].astype(jnp.float32))
    acc_ref[...] += jnp.dot(h1.astype(w2_ref.dtype), w2_ref[...],
                            preferred_element_type=jnp.float32)

    @pl.when(k == pl.num_programs(1) - 1)
    def _finalize():
        h2 = acc_ref[...] + b2_ref[...].astype(jnp.float32)
        out = _layernorm(zn_ref[...] + h2,
                         g2_ref[...].astype(jnp.float32),
                         be2_ref[...].astype(jnp.float32))
        o_ref[...] = out.astype(o_ref.dtype)


def _round_down(v, m):
    return (v // m) * m


def _pick_row_tile(n, dtype, tile_rows):
    itemsize = jnp.dtype(dtype).itemsize
    min_rows = max(8, 32 // max(1, itemsize))   # 8 f32 / 16 bf16 / 32 int8-fp8
    if n <= tile_rows:
        return n                                # full extent: always layout-legal
    return max(min_rows, _round_down(tile_rows, min_rows))


def _pick_hidden_tile(fea, hid, w_itemsize):
    # Keep the streamed (double-buffered) W1/W2 blocks around <=16 MiB so the
    # kernel fits comfortably inside v7x's 64 MiB VMEM at realistic F.
    if 2 * fea * hid * w_itemsize <= 12 * 1024 * 1024:
        return hid                              # fully VMEM-resident weights
    budget = 16 * 1024 * 1024
    th = max(128, _round_down(budget // (4 * fea * w_itemsize), 128))
    while th >= 128:
        if hid % th == 0:
            return th
        th -= 128
    return hid


def _spec(shape, index_map, single_buffer):
    """BlockSpec; request single buffering for constant-index operands."""
    if single_buffer and hasattr(pl, "Buffered"):
        try:
            return pl.BlockSpec(shape, index_map, pipeline_mode=pl.Buffered(1))
        except Exception:
            pass
    return pl.BlockSpec(shape, index_map)


def ffn_postln(x, z, w1, b1, w2, b2, gamma1, beta1, gamma2, beta2,
               *, tile_rows=256):
    """Pallas implementation of FFN_PostLN.forward (eval mode)."""
    fea = x.shape[-1]
    hid = w1.shape[-1]
    lead_shape = x.shape[:-1]

    n = 1
    for d in lead_shape:
        n *= d
    x2 = x.reshape(n, fea)
    z2 = z.reshape(n, fea)

    x_item = jnp.dtype(x.dtype).itemsize
    w_item = jnp.dtype(w1.dtype).itemsize

    tm = _pick_row_tile(n, x.dtype, tile_rows)
    th = _pick_hidden_tile(fea, hid, w_item)
    n_rows = pl.cdiv(n, tm)
    n_k = hid // th

    # 2-D views for biases / LN params (TPU layout rules).
    b1_2 = b1.reshape(1, hid)
    b2_2 = b2.reshape(1, fea)
    g1_2 = gamma1.reshape(1, fea)
    be1_2 = beta1.reshape(1, fea)
    g2_2 = gamma2.reshape(1, fea)
    be2_2 = beta2.reshape(1, fea)

    # --- VMEM budget: streamed tiles + weight blocks + scratch + h1 slack. ---
    w_bufs = 1 if n_k == 1 else 2
    vmem_est = (
        2 * 2 * tm * fea * x_item              # x, z tiles (double-buffered)
        + 2 * tm * fea * x_item                # output tile
        + w_bufs * 2 * fea * th * w_item       # W1 / W2 blocks
        + w_bufs * th * w_item + 8 * fea * 4   # b1 block + LN params / b2
        + 2 * tm * fea * 4                     # zn + acc scratch (f32)
        + 2 * tm * th * 4                      # h1 intermediate headroom (f32)
    )
    vmem_limit = int(vmem_est * 1.4) + (4 << 20)
    vmem_limit = min(max(vmem_limit, 32 << 20), 48 << 20)

    cost = pl.CostEstimate(
        flops=int(4 * n * fea * hid),
        transcendentals=int(n * hid),
        bytes_accessed=int(3 * n * fea * x_item + 2 * fea * hid * w_item),
    )

    def build(single_buffer):
        row_spec = pl.BlockSpec((tm, fea), lambda i, k: (i, 0))
        const = lambda shape: _spec(shape, lambda i, k: (0, 0), single_buffer)
        w_single = single_buffer and (n_k == 1)
        in_specs = [
            row_spec,                                          # x tile
            row_spec,                                          # z tile
            _spec((fea, th), lambda i, k: (0, k), w_single),   # W1 block
            _spec((1, th), lambda i, k: (0, k), w_single),     # b1 block
            _spec((th, fea), lambda i, k: (k, 0), w_single),   # W2 block
            const((1, fea)),                                   # b2
            const((1, fea)),                                   # gamma1
            const((1, fea)),                                   # beta1
            const((1, fea)),                                   # gamma2
            const((1, fea)),                                   # beta2
        ]
        return pl.pallas_call(
            ffn_postln_kernel,
            out_shape=jax.ShapeDtypeStruct((n, fea), x.dtype),
            grid_spec=pltpu.PrefetchScalarGridSpec(
                num_scalar_prefetch=0,
                grid=(n_rows, n_k),
                in_specs=in_specs,
                out_specs=pl.BlockSpec((tm, fea), lambda i, k: (i, 0)),
                scratch_shapes=[pltpu.VMEM((tm, fea), jnp.float32),   # zn
                                pltpu.VMEM((tm, fea), jnp.float32)],  # acc
            ),
            compiler_params=pltpu.CompilerParams(
                dimension_semantics=("parallel", "arbitrary"),
                vmem_limit_bytes=vmem_limit,
            ),
            cost_estimate=cost,
        )

    args = (x2, z2, w1, b1_2, w2, b2_2, g1_2, be1_2, g2_2, be2_2)
    try:
        out = jax.block_until_ready(build(single_buffer=True)(*args))
    except Exception:
        # Fallback for JAX versions without BlockSpec pipeline_mode support.
        out = build(single_buffer=False)(*args)

    return out.reshape(*lead_shape, fea)


def _reference(x, z, w1, b1, w2, b2, gamma1, beta1, gamma2, beta2):
    """Pure-JAX reference matching the PyTorch module in eval mode."""
    def ln(h, g, b):
        m = jnp.mean(h, axis=-1, keepdims=True)
        c = h - m
        v = jnp.mean(c * c, axis=-1, keepdims=True)
        return c / jnp.sqrt(v + LN_EPS) * g + b

    zn = ln(x + z, gamma1, beta1)
    h1 = zn @ w1 + b1
    h1 = jax.nn.gelu(h1, approximate=False)   # exact GELU, as PyTorch default
    h2 = h1 @ w2 + b2
    return ln(zn + h2, gamma2, beta2)


if __name__ == "__main__":
    key = jax.random.PRNGKey(0)
    ks = jax.random.split(key, 10)

    # Small shapes consistent with the module: (batch=2, seq=8, feaSize=32).
    B, S, F = 2, 8, 32
    H = 4 * F

    x = jax.random.normal(ks[0], (B, S, F), dtype=jnp.float32)
    z = jax.random.normal(ks[1], (B, S, F), dtype=jnp.float32)
    w1 = jax.random.normal(ks[2], (F, H), dtype=jnp.float32) / math.sqrt(F)
    b1 = 0.1 * jax.random.normal(ks[3], (H,), dtype=jnp.float32)
    w2 = jax.random.normal(ks[4], (H, F), dtype=jnp.float32) / math.sqrt(H)
    b2 = 0.1 * jax.random.normal(ks[5], (F,), dtype=jnp.float32)
    gamma1 = 1.0 + 0.1 * jax.random.normal(ks[6], (F,), dtype=jnp.float32)
    beta1 = 0.1 * jax.random.normal(ks[7], (F,), dtype=jnp.float32)
    gamma2 = 1.0 + 0.1 * jax.random.normal(ks[8], (F,), dtype=jnp.float32)
    beta2 = 0.1 * jax.random.normal(ks[9], (F,), dtype=jnp.float32)

    out = ffn_postln(x, z, w1, b1, w2, b2, gamma1, beta1, gamma2, beta2)
    out = jax.block_until_ready(out)

    ref = jax.block_until_ready(
        _reference(x, z, w1, b1, w2, b2, gamma1, beta1, gamma2, beta2))

    assert out.shape == (B, S, F), out.shape
    assert jnp.allclose(out, ref, rtol=1e-4, atol=1e-4), (
        float(jnp.max(jnp.abs(out - ref))))

    print("KERNEL_OK")
</pallas_src>

<mosaic_0001>
module attributes {stable_mosaic.version = 11 : i64} {
  func.func @ffn_postln_kernel(%arg0: i32, %arg1: i32, %arg2: memref<16x32xf32, #tpu.memory_space<vmem>>, %arg3: memref<16x32xf32, #tpu.memory_space<vmem>>, %arg4: memref<32x128xf32, #tpu.memory_space<vmem>>, %arg5: memref<1x128xf32, #tpu.memory_space<vmem>>, %arg6: memref<128x32xf32, #tpu.memory_space<vmem>>, %arg7: memref<1x32xf32, #tpu.memory_space<vmem>>, %arg8: memref<1x32xf32, #tpu.memory_space<vmem>>, %arg9: memref<1x32xf32, #tpu.memory_space<vmem>>, %arg10: memref<1x32xf32, #tpu.memory_space<vmem>>, %arg11: memref<1x32xf32, #tpu.memory_space<vmem>>, %arg12: memref<16x32xf32, #tpu.memory_space<vmem>>, %arg13: memref<16x32xf32, #tpu.memory_space<vmem>>, %arg14: memref<16x32xf32, #tpu.memory_space<vmem>>) attributes {dimension_semantics = [#tpu.dimension_semantics<parallel>, #tpu.dimension_semantics<arbitrary>], iteration_bounds = array<i64: 1, 1>, scalar_prefetch = 0 : i64, scratch_operands = 2 : i64, tpu.core_type = #tpu.core_type<tc>, window_params = [{transform_indices = @transform_0, window_bounds = array<i64: 16, 32>}, {transform_indices = @transform_1, window_bounds = array<i64: 16, 32>}, {pipeline_mode = #tpu.pipeline_mode<synchronous>, transform_indices = @transform_2, window_bounds = array<i64: 32, 128>}, {pipeline_mode = #tpu.pipeline_mode<synchronous>, transform_indices = @transform_3, window_bounds = array<i64: 1, 128>}, {pipeline_mode = #tpu.pipeline_mode<synchronous>, transform_indices = @transform_4, window_bounds = array<i64: 128, 32>}, {pipeline_mode = #tpu.pipeline_mode<synchronous>, transform_indices = @transform_5, window_bounds = array<i64: 1, 32>}, {pipeline_mode = #tpu.pipeline_mode<synchronous>, transform_indices = @transform_6, window_bounds = array<i64: 1, 32>}, {pipeline_mode = #tpu.pipeline_mode<synchronous>, transform_indices = @transform_7, window_bounds = array<i64: 1, 32>}, {pipeline_mode = #tpu.pipeline_mode<synchronous>, transform_indices = @transform_8, window_bounds = array<i64: 1, 32>}, {pipeline_mode = #tpu.pipeline_mode<synchronous>, transform_indices = @transform_9, window_bounds = array<i64: 1, 32>}, {transform_indices = @transform_10, window_bounds = array<i64: 16, 32>}]} {
    %c0_i32 = arith.constant 0 : i32
    %0 = arith.cmpi eq, %arg1, %c0_i32 : i32
    %1 = arith.extui %0 : i1 to i32
    %c0_i32_0 = arith.constant 0 : i32
    %2 = arith.cmpi ne, %1, %c0_i32_0 : i32
    scf.if %2 {
      %c0_30 = arith.constant 0 : index
      %c0_31 = arith.constant 0 : index
      %57 = vector.load %arg2[%c0_30, %c0_31] : memref<16x32xf32, #tpu.memory_space<vmem>>, vector<16x32xf32>
      %c0_32 = arith.constant 0 : index
      %c0_33 = arith.constant 0 : index
      %58 = vector.load %arg3[%c0_32, %c0_33] : memref<16x32xf32, #tpu.memory_space<vmem>>, vector<16x32xf32>
      %59 = arith.addf %57, %58 : vector<16x32xf32>
      %c0_34 = arith.constant 0 : index
      %c0_35 = arith.constant 0 : index
      %60 = vector.load %arg8[%c0_34, %c0_35] : memref<1x32xf32, #tpu.memory_space<vmem>>, vector<1x32xf32>
      %c0_36 = arith.constant 0 : index
      %c0_37 = arith.constant 0 : index
      %61 = vector.load %arg9[%c0_36, %c0_37] : memref<1x32xf32, #tpu.memory_space<vmem>>, vector<1x32xf32>
      %cst_38 = arith.constant dense<0.000000e+00> : vector<16xf32>
      %62 = vector.multi_reduction <add>, %59, %cst_38 [1] : vector<16x32xf32> to vector<16xf32>
      %63 = vector.shape_cast %62 : vector<16xf32> to vector<16x1xf32>
      %cst_39 = arith.constant 3.200000e+01 : f32
      %64 = vector.broadcast %cst_39 : f32 to vector<16x1xf32>
      %65 = arith.divf %63, %64 : vector<16x1xf32>
      %66 = vector.broadcast %65 : vector<16x1xf32> to vector<16x32xf32>
      %67 = arith.subf %59, %66 : vector<16x32xf32>
      %68 = arith.mulf %67, %67 : vector<16x32xf32>
      %cst_40 = arith.constant dense<0.000000e+00> : vector<16xf32>
      %69 = vector.multi_reduction <add>, %68, %cst_40 [1] : vector<16x32xf32> to vector<16xf32>
      %70 = vector.shape_cast %69 : vector<16xf32> to vector<16x1xf32>
      %cst_41 = arith.constant 3.200000e+01 : f32
      %71 = vector.broadcast %cst_41 : f32 to vector<16x1xf32>
      %72 = arith.divf %70, %71 : vector<16x1xf32>
      %cst_42 = arith.constant 9.99999974E-6 : f32
      %73 = vector.broadcast %cst_42 : f32 to vector<16x1xf32>
      %74 = arith.addf %72, %73 : vector<16x1xf32>
      %75 = math.rsqrt %74 : vector<16x1xf32>
      %76 = vector.broadcast %75 : vector<16x1xf32> to vector<16x32xf32>
      %77 = arith.mulf %67, %76 : vector<16x32xf32>
      %78 = vector.broadcast %60 : vector<1x32xf32> to vector<16x32xf32>
      %79 = arith.mulf %77, %78 : vector<16x32xf32>
      %80 = vector.broadcast %61 : vector<1x32xf32> to vector<16x32xf32>
      %81 = arith.addf %79, %80 : vector<16x32xf32>
      %c0_43 = arith.constant 0 : index
      %c0_44 = arith.constant 0 : index
      %82 = vector.load %arg13[%c0_43, %c0_44] : memref<16x32xf32, #tpu.memory_space<vmem>>, vector<16x32xf32>
      tpu.vector_store %arg13[%c0_43, %c0_44], %81 {strides = array<i32>} : memref<16x32xf32, #tpu.memory_space<vmem>>, vector<16x32xf32>,
      %cst_45 = arith.constant 0.000000e+00 : f32
      %83 = vector.broadcast %cst_45 : f32 to vector<16x32xf32>
      %c0_46 = arith.constant 0 : index
      %c0_47 = arith.constant 0 : index
      %84 = vector.load %arg14[%c0_46, %c0_47] : memref<16x32xf32, #tpu.memory_space<vmem>>, vector<16x32xf32>
      tpu.vector_store %arg14[%c0_46, %c0_47], %83 {strides = array<i32>} : memref<16x32xf32, #tpu.memory_space<vmem>>, vector<16x32xf32>,
    } else {
    }
    %c0 = arith.constant 0 : index
    %c0_1 = arith.constant 0 : index
    %3 = vector.load %arg13[%c0, %c0_1] : memref<16x32xf32, #tpu.memory_space<vmem>>, vector<16x32xf32>
    %c0_2 = arith.constant 0 : index
    %c0_3 = arith.constant 0 : index
    %4 = vector.load %arg4[%c0_2, %c0_3] : memref<32x128xf32, #tpu.memory_space<vmem>>, vector<32x128xf32>
    %cst = arith.constant dense<0.000000e+00> : vector<16x128xf32>
    %5 = tpu.matmul %3, %4, %cst {dimension_numbers = #tpu.dot_dimension_numbers<[1], [0], [0], [1], [0, 0, 1, 1], [], []>} : vector<16x32xf32>, vector<32x128xf32>, vector<16x128xf32> -> vector<16x128xf32>
    %c0_4 = arith.constant 0 : index
    %c0_5 = arith.constant 0 : index
    %6 = vector.load %arg5[%c0_4, %c0_5] : memref<1x128xf32, #tpu.memory_space<vmem>>, vector<1x128xf32>
    %7 = vector.broadcast %6 : vector<1x128xf32> to vector<16x128xf32>
    %8 = arith.addf %5, %7 : vector<16x128xf32>
    %cst_6 = arith.constant 5.000000e-01 : f32
    %9 = vector.broadcast %cst_6 : f32 to vector<16x128xf32>
    %10 = arith.mulf %9, %8 : vector<16x128xf32>
    %cst_7 = arith.constant 0.707106769 : f32
    %11 = vector.broadcast %cst_7 : f32 to vector<16x128xf32>
    %12 = arith.mulf %8, %11 : vector<16x128xf32>
    %13 = math.absf %12 : vector<16x128xf32>
    %cst_8 = arith.constant 0.327591091 : f32
    %14 = vector.broadcast %cst_8 : f32 to vector<16x128xf32>
    %15 = arith.mulf %14, %13 : vector<16x128xf32>
    %cst_9 = arith.constant 1.000000e+00 : f32
    %16 = vector.broadcast %cst_9 : f32 to vector<16x128xf32>
    %17 = arith.addf %16, %15 : vector<16x128xf32>
    %cst_10 = arith.constant 1.000000e+00 : f32
    %18 = vector.broadcast %cst_10 : f32 to vector<16x128xf32>
    %19 = arith.divf %18, %17 : vector<16x128xf32>
    %cst_11 = arith.constant 1.06140542 : f32
    %20 = vector.broadcast %cst_11 : f32 to vector<16x128xf32>
    %21 = arith.mulf %19, %20 : vector<16x128xf32>
    %cst_12 = arith.constant -1.45315206 : f32
    %22 = vector.broadcast %cst_12 : f32 to vector<16x128xf32>
    %23 = arith.addf %22, %21 : vector<16x128xf32>
    %24 = arith.mulf %19, %23 : vector<16x128xf32>
    %cst_13 = arith.constant 1.42141378 : f32
    %25 = vector.broadcast %cst_13 : f32 to vector<16x128xf32>
    %26 = arith.addf %25, %24 : vector<16x128xf32>
    %27 = arith.mulf %19, %26 : vector<16x128xf32>
    %cst_14 = arith.constant -0.284496725 : f32
    %28 = vector.broadcast %cst_14 : f32 to vector<16x128xf32>
    %29 = arith.addf %28, %27 : vector<16x128xf32>
    %30 = arith.mulf %19, %29 : vector<16x128xf32>
    %cst_15 = arith.constant 0.254829586 : f32
    %31 = vector.broadcast %cst_15 : f32 to vector<16x128xf32>
    %32 = arith.addf %31, %30 : vector<16x128xf32>
    %33 = arith.mulf %19, %32 : vector<16x128xf32>
    %cst_16 = arith.constant 0.000000e+00 : f32
    %34 = vector.broadcast %cst_16 : f32 to vector<16x128xf32>
    %35 = arith.subf %34, %13 : vector<16x128xf32>
    %36 = arith.mulf %35, %13 : vector<16x128xf32>
    %37 = math.exp %36 : vector<16x128xf32>
    %38 = arith.mulf %33, %37 : vector<16x128xf32>
    %cst_17 = arith.constant 1.000000e+00 : f32
    %39 = vector.broadcast %cst_17 : f32 to vector<16x128xf32>
    %40 = arith.subf %39, %38 : vector<16x128xf32>
    %cst_18 = arith.constant 0.000000e+00 : f32
    %41 = vector.broadcast %cst_18 : f32 to vector<16x128xf32>
    %42 = arith.cmpf oge, %12, %41 : vector<16x128xf32>
    %cst_19 = arith.constant 0.000000e+00 : f32
    %43 = vector.broadcast %cst_19 : f32 to vector<16x128xf32>
    %44 = arith.subf %43, %40 : vector<16x128xf32>
    %45 = arith.select %42, %40, %44 : vector<16x128xi1>, vector<16x128xf32>
    %cst_20 = arith.constant 1.000000e+00 : f32
    %46 = vector.broadcast %cst_20 : f32 to vector<16x128xf32>
    %47 = arith.addf %46, %45 : vector<16x128xf32>
    %48 = arith.mulf %10, %47 : vector<16x128xf32>
    %c0_21 = arith.constant 0 : index
    %c0_22 = arith.constant 0 : index
    %49 = vector.load %arg14[%c0_21, %c0_22] : memref<16x32xf32, #tpu.memory_space<vmem>>, vector<16x32xf32>
    %c0_23 = arith.constant 0 : index
    %c0_24 = arith.constant 0 : index
    %50 = vector.load %arg6[%c0_23, %c0_24] : memref<128x32xf32, #tpu.memory_space<vmem>>, vector<128x32xf32>
    %cst_25 = arith.constant dense<0.000000e+00> : vector<16x32xf32>
    %51 = tpu.matmul %48, %50, %cst_25 {dimension_numbers = #tpu.dot_dimension_numbers<[1], [0], [0], [1], [0, 0, 1, 1], [], []>} : vector<16x128xf32>, vector<128x32xf32>, vector<16x32xf32> -> vector<16x32xf32>
    %52 = arith.addf %49, %51 : vector<16x32xf32>
    %c0_26 = arith.constant 0 : index
    %c0_27 = arith.constant 0 : index
    %53 = vector.load %arg14[%c0_26, %c0_27] : memref<16x32xf32, #tpu.memory_space<vmem>>, vector<16x32xf32>
    tpu.vector_store %arg14[%c0_26, %c0_27], %52 {strides = array<i32>} : memref<16x32xf32, #tpu.memory_space<vmem>>, vector<16x32xf32>,
    %c0_i32_28 = arith.constant 0 : i32
    %54 = arith.cmpi eq, %arg1, %c0_i32_28 : i32
    %55 = arith.extui %54 : i1 to i32
    %c0_i32_29 = arith.constant 0 : i32
    %56 = arith.cmpi ne, %55, %c0_i32_29 : i32
    scf.if %56 {
      %c0_30 = arith.constant 0 : index
      %c0_31 = arith.constant 0 : index
      %57 = vector.load %arg14[%c0_30, %c0_31] : memref<16x32xf32, #tpu.memory_space<vmem>>, vector<16x32xf32>
      %c0_32 = arith.constant 0 : index
      %c0_33 = arith.constant 0 : index
      %58 = vector.load %arg7[%c0_32, %c0_33] : memref<1x32xf32, #tpu.memory_space<vmem>>, vector<1x32xf32>
      %59 = vector.broadcast %58 : vector<1x32xf32> to vector<16x32xf32>
      %60 = arith.addf %57, %59 : vector<16x32xf32>
      %c0_34 = arith.constant 0 : index
      %c0_35 = arith.constant 0 : index
      %61 = vector.load %arg13[%c0_34, %c0_35] : memref<16x32xf32, #tpu.memory_space<vmem>>, vector<16x32xf32>
      %62 = arith.addf %61, %60 : vector<16x32xf32>
      %c0_36 = arith.constant 0 : index
      %c0_37 = arith.constant 0 : index
      %63 = vector.load %arg10[%c0_36, %c0_37] : memref<1x32xf32, #tpu.memory_space<vmem>>, vector<1x32xf32>
      %c0_38 = arith.constant 0 : index
      %c0_39 = arith.constant 0 : index
      %64 = vector.load %arg11[%c0_38, %c0_39] : memref<1x32xf32, #tpu.memory_space<vmem>>, vector<1x32xf32>
      %cst_40 = arith.constant dense<0.000000e+00> : vector<16xf32>
      %65 = vector.multi_reduction <add>, %62, %cst_40 [1] : vector<16x32xf32> to vector<16xf32>
      %66 = vector.shape_cast %65 : vector<16xf32> to vector<16x1xf32>
      %cst_41 = arith.constant 3.200000e+01 : f32
      %67 = vector.broadcast %cst_41 : f32 to vector<16x1xf32>
      %68 = arith.divf %66, %67 : vector<16x1xf32>
      %69 = vector.broadcast %68 : vector<16x1xf32> to vector<16x32xf32>
      %70 = arith.subf %62, %69 : vector<16x32xf32>
      %71 = arith.mulf %70, %70 : vector<16x32xf32>
      %cst_42 = arith.constant dense<0.000000e+00> : vector<16xf32>
      %72 = vector.multi_reduction <add>, %71, %cst_42 [1] : vector<16x32xf32> to vector<16xf32>
      %73 = vector.shape_cast %72 : vector<16xf32> to vector<16x1xf32>
      %cst_43 = arith.constant 3.200000e+01 : f32
      %74 = vector.broadcast %cst_43 : f32 to vector<16x1xf32>
      %75 = arith.divf %73, %74 : vector<16x1xf32>
      %cst_44 = arith.constant 9.99999974E-6 : f32
      %76 = vector.broadcast %cst_44 : f32 to vector<16x1xf32>
      %77 = arith.addf %75, %76 : vector<16x1xf32>
      %78 = math.rsqrt %77 : vector<16x1xf32>
      %79 = vector.broadcast %78 : vector<16x1xf32> to vector<16x32xf32>
      %80 = arith.mulf %70, %79 : vector<16x32xf32>
      %81 = vector.broadcast %63 : vector<1x32xf32> to vector<16x32xf32>
      %82 = arith.mulf %80, %81 : vector<16x32xf32>
      %83 = vector.broadcast %64 : vector<1x32xf32> to vector<16x32xf32>
      %84 = arith.addf %82, %83 : vector<16x32xf32>
      %c0_45 = arith.constant 0 : index
      %c0_46 = arith.constant 0 : index
      %85 = vector.load %arg12[%c0_45, %c0_46] : memref<16x32xf32, #tpu.memory_space<vmem>>, vector<16x32xf32>
      tpu.vector_store %arg12[%c0_45, %c0_46], %84 {strides = array<i32>} : memref<16x32xf32, #tpu.memory_space<vmem>>, vector<16x32xf32>,
    } else {
    }
    return
  }
  func.func @transform_0(%arg0: i32, %arg1: i32) -> (i32, i32) {
    %c0_i32 = arith.constant 0 : i32
    %c0_i32_0 = arith.constant 0 : i32
    return %arg0, %c0_i32 : i32, i32
  }
  func.func @transform_1(%arg0: i32, %arg1: i32) -> (i32, i32) {
    %c0_i32 = arith.constant 0 : i32
    %c0_i32_0 = arith.constant 0 : i32
    return %arg0, %c0_i32 : i32, i32
  }
  func.func @transform_2(%arg0: i32, %arg1: i32) -> (i32, i32) {
    %c0_i32 = arith.constant 0 : i32
    %c0_i32_0 = arith.constant 0 : i32
    return %c0_i32, %arg1 : i32, i32
  }
  func.func @transform_3(%arg0: i32, %arg1: i32) -> (i32, i32) {
    %c0_i32 = arith.constant 0 : i32
    %c0_i32_0 = arith.constant 0 : i32
    return %c0_i32, %arg1 : i32, i32
  }
  func.func @transform_4(%arg0: i32, %arg1: i32) -> (i32, i32) {
    %c0_i32 = arith.constant 0 : i32
    %c0_i32_0 = arith.constant 0 : i32
    return %arg1, %c0_i32 : i32, i32
  }
  func.func @transform_5(%arg0: i32, %arg1: i32) -> (i32, i32) {
    %c0_i32 = arith.constant 0 : i32
    %c0_i32_0 = arith.constant 0 : i32
    %c0_i32_1 = arith.constant 0 : i32
    return %c0_i32, %c0_i32_0 : i32, i32
  }
  func.func @transform_6(%arg0: i32, %arg1: i32) -> (i32, i32) {
    %c0_i32 = arith.constant 0 : i32
    %c0_i32_0 = arith.constant 0 : i32
    %c0_i32_1 = arith.constant 0 : i32
    return %c0_i32, %c0_i32_0 : i32, i32
  }
  func.func @transform_7(%arg0: i32, %arg1: i32) -> (i32, i32) {
    %c0_i32 = arith.constant 0 : i32
    %c0_i32_0 = arith.constant 0 : i32
    %c0_i32_1 = arith.constant 0 : i32
    return %c0_i32, %c0_i32_0 : i32, i32
  }
  func.func @transform_8(%arg0: i32, %arg1: i32) -> (i32, i32) {
    %c0_i32 = arith.constant 0 : i32
    %c0_i32_0 = arith.constant 0 : i32
    %c0_i32_1 = arith.constant 0 : i32
    return %c0_i32, %c0_i32_0 : i32, i32
  }
  func.func @transform_9(%arg0: i32, %arg1: i32) -> (i32, i32) {
    %c0_i32 = arith.constant 0 : i32
    %c0_i32_0 = arith.constant 0 : i32
    %c0_i32_1 = arith.constant 0 : i32
    return %c0_i32, %c0_i32_0 : i32, i32
  }
  func.func @transform_10(%arg0: i32, %arg1: i32) -> (i32, i32) {
    %c0_i32 = arith.constant 0 : i32
    %c0_i32_0 = arith.constant 0 : i32
    return %arg0, %c0_i32 : i32, i32
  }
}

module attributes {stable_mosaic.version = 11 : i64} {
  func.func @ffn_postln_kernel(%arg0: i32, %arg1: i32, %arg2: memref<16x32xf32, #tpu.memory_space<vmem>>, %arg3: memref<16x32xf32, #tpu.memory_space<vmem>>, %arg4: memref<32x128xf32, #tpu.memory_space<vmem>>, %arg5: memref<1x128xf32, #tpu.memory_space<vmem>>, %arg6: memref<128x32xf32, #tpu.memory_space<vmem>>, %arg7: memref<1x32xf32, #tpu.memory_space<vmem>>, %arg8: memref<1x32xf32, #tpu.memory_space<vmem>>, %arg9: memref<1x32xf32, #tpu.memory_space<vmem>>, %arg10: memref<1x32xf32, #tpu.memory_space<vmem>>, %arg11: memref<1x32xf32, #tpu.memory_space<vmem>>, %arg12: memref<16x32xf32, #tpu.memory_space<vmem>>, %arg13: memref<16x32xf32, #tpu.memory_space<vmem>>, %arg14: memref<16x32xf32, #tpu.memory_space<vmem>>) attributes {dimension_semantics = [#tpu.dimension_semantics<parallel>, #tpu.dimension_semantics<arbitrary>], iteration_bounds = array<i64: 1, 1>, scalar_prefetch = 0 : i64, scratch_operands = 2 : i64, tpu.core_type = #tpu.core_type<tc>, window_params = [{transform_indices = @transform_0, window_bounds = array<i64: 16, 32>}, {transform_indices = @transform_1, window_bounds = array<i64: 16, 32>}, {transform_indices = @transform_2, window_bounds = array<i64: 32, 128>}, {transform_indices = @transform_3, window_bounds = array<i64: 1, 128>}, {transform_indices = @transform_4, window_bounds = array<i64: 128, 32>}, {pipeline_mode = #tpu.pipeline_mode<synchronous>, transform_indices = @transform_5, window_bounds = array<i64: 1, 32>}, {pipeline_mode = #tpu.pipeline_mode<synchronous>, transform_indices = @transform_6, window_bounds = array<i64: 1, 32>}, {pipeline_mode = #tpu.pipeline_mode<synchronous>, transform_indices = @transform_7, window_bounds = array<i64: 1, 32>}, {pipeline_mode = #tpu.pipeline_mode<synchronous>, transform_indices = @transform_8, window_bounds = array<i64: 1, 32>}, {pipeline_mode = #tpu.pipeline_mode<synchronous>, transform_indices = @transform_9, window_bounds = array<i64: 1, 32>}, {transform_indices = @transform_10, window_bounds = array<i64: 16, 32>}]} {
    %c0_i32 = arith.constant 0 : i32
    %0 = arith.cmpi eq, %arg1, %c0_i32 : i32
    %1 = arith.extui %0 : i1 to i32
    %c0_i32_0 = arith.constant 0 : i32
    %2 = arith.cmpi ne, %1, %c0_i32_0 : i32
    scf.if %2 {
      %c0_30 = arith.constant 0 : index
      %c0_31 = arith.constant 0 : index
      %57 = vector.load %arg2[%c0_30, %c0_31] : memref<16x32xf32, #tpu.memory_space<vmem>>, vector<16x32xf32>
      %c0_32 = arith.constant 0 : index
      %c0_33 = arith.constant 0 : index
      %58 = vector.load %arg3[%c0_32, %c0_33] : memref<16x32xf32, #tpu.memory_space<vmem>>, vector<16x32xf32>
      %59 = arith.addf %57, %58 : vector<16x32xf32>
      %c0_34 = arith.constant 0 : index
      %c0_35 = arith.constant 0 : index
      %60 = vector.load %arg8[%c0_34, %c0_35] : memref<1x32xf32, #tpu.memory_space<vmem>>, vector<1x32xf32>
      %c0_36 = arith.constant 0 : index
      %c0_37 = arith.constant 0 : index
      %61 = vector.load %arg9[%c0_36, %c0_37] : memref<1x32xf32, #tpu.memory_space<vmem>>, vector<1x32xf32>
      %cst_38 = arith.constant dense<0.000000e+00> : vector<16xf32>
      %62 = vector.multi_reduction <add>, %59, %cst_38 [1] : vector<16x32xf32> to vector<16xf32>
      %63 = vector.shape_cast %62 : vector<16xf32> to vector<16x1xf32>
      %cst_39 = arith.constant 3.200000e+01 : f32
      %64 = vector.broadcast %cst_39 : f32 to vector<16x1xf32>
      %65 = arith.divf %63, %64 : vector<16x1xf32>
      %66 = vector.broadcast %65 : vector<16x1xf32> to vector<16x32xf32>
      %67 = arith.subf %59, %66 : vector<16x32xf32>
      %68 = arith.mulf %67, %67 : vector<16x32xf32>
      %cst_40 = arith.constant dense<0.000000e+00> : vector<16xf32>
      %69 = vector.multi_reduction <add>, %68, %cst_40 [1] : vector<16x32xf32> to vector<16xf32>
      %70 = vector.shape_cast %69 : vector<16xf32> to vector<16x1xf32>
      %cst_41 = arith.constant 3.200000e+01 : f32
      %71 = vector.broadcast %cst_41 : f32 to vector<16x1xf32>
      %72 = arith.divf %70, %71 : vector<16x1xf32>
      %cst_42 = arith.constant 9.99999974E-6 : f32
      %73 = vector.broadcast %cst_42 : f32 to vector<16x1xf32>
      %74 = arith.addf %72, %73 : vector<16x1xf32>
      %75 = math.rsqrt %74 : vector<16x1xf32>
      %76 = vector.broadcast %75 : vector<16x1xf32> to vector<16x32xf32>
      %77 = arith.mulf %67, %76 : vector<16x32xf32>
      %78 = vector.broadcast %60 : vector<1x32xf32> to vector<16x32xf32>
      %79 = arith.mulf %77, %78 : vector<16x32xf32>
      %80 = vector.broadcast %61 : vector<1x32xf32> to vector<16x32xf32>
      %81 = arith.addf %79, %80 : vector<16x32xf32>
      %c0_43 = arith.constant 0 : index
      %c0_44 = arith.constant 0 : index
      %82 = vector.load %arg13[%c0_43, %c0_44] : memref<16x32xf32, #tpu.memory_space<vmem>>, vector<16x32xf32>
      tpu.vector_store %arg13[%c0_43, %c0_44], %81 {strides = array<i32>} : memref<16x32xf32, #tpu.memory_space<vmem>>, vector<16x32xf32>,
      %cst_45 = arith.constant 0.000000e+00 : f32
      %83 = vector.broadcast %cst_45 : f32 to vector<16x32xf32>
      %c0_46 = arith.constant 0 : index
      %c0_47 = arith.constant 0 : index
      %84 = vector.load %arg14[%c0_46, %c0_47] : memref<16x32xf32, #tpu.memory_space<vmem>>, vector<16x32xf32>
      tpu.vector_store %arg14[%c0_46, %c0_47], %83 {strides = array<i32>} : memref<16x32xf32, #tpu.memory_space<vmem>>, vector<16x32xf32>,
    } else {
    }
    %c0 = arith.constant 0 : index
    %c0_1 = arith.constant 0 : index
    %3 = vector.load %arg13[%c0, %c0_1] : memref<16x32xf32, #tpu.memory_space<vmem>>, vector<16x32xf32>
    %c0_2 = arith.constant 0 : index
    %c0_3 = arith.constant 0 : index
    %4 = vector.load %arg4[%c0_2, %c0_3] : memref<32x128xf32, #tpu.memory_space<vmem>>, vector<32x128xf32>
    %cst = arith.constant dense<0.000000e+00> : vector<16x128xf32>
    %5 = tpu.matmul %3, %4, %cst {dimension_numbers = #tpu.dot_dimension_numbers<[1], [0], [0], [1], [0, 0, 1, 1], [], []>} : vector<16x32xf32>, vector<32x128xf32>, vector<16x128xf32> -> vector<16x128xf32>
    %c0_4 = arith.constant 0 : index
    %c0_5 = arith.constant 0 : index
    %6 = vector.load %arg5[%c0_4, %c0_5] : memref<1x128xf32, #tpu.memory_space<vmem>>, vector<1x128xf32>
    %7 = vector.broadcast %6 : vector<1x128xf32> to vector<16x128xf32>
    %8 = arith.addf %5, %7 : vector<16x128xf32>
    %cst_6 = arith.constant 5.000000e-01 : f32
    %9 = vector.broadcast %cst_6 : f32 to vector<16x128xf32>
    %10 = arith.mulf %9, %8 : vector<16x128xf32>
    %cst_7 = arith.constant 0.707106769 : f32
    %11 = vector.broadcast %cst_7 : f32 to vector<16x128xf32>
    %12 = arith.mulf %8, %11 : vector<16x128xf32>
    %13 = math.absf %12 : vector<16x128xf32>
    %cst_8 = arith.constant 0.327591091 : f32
    %14 = vector.broadcast %cst_8 : f32 to vector<16x128xf32>
    %15 = arith.mulf %14, %13 : vector<16x128xf32>
    %cst_9 = arith.constant 1.000000e+00 : f32
    %16 = vector.broadcast %cst_9 : f32 to vector<16x128xf32>
    %17 = arith.addf %16, %15 : vector<16x128xf32>
    %cst_10 = arith.constant 1.000000e+00 : f32
    %18 = vector.broadcast %cst_10 : f32 to vector<16x128xf32>
    %19 = arith.divf %18, %17 : vector<16x128xf32>
    %cst_11 = arith.constant 1.06140542 : f32
    %20 = vector.broadcast %cst_11 : f32 to vector<16x128xf32>
    %21 = arith.mulf %19, %20 : vector<16x128xf32>
    %cst_12 = arith.constant -1.45315206 : f32
    %22 = vector.broadcast %cst_12 : f32 to vector<16x128xf32>
    %23 = arith.addf %22, %21 : vector<16x128xf32>
    %24 = arith.mulf %19, %23 : vector<16x128xf32>
    %cst_13 = arith.constant 1.42141378 : f32
    %25 = vector.broadcast %cst_13 : f32 to vector<16x128xf32>
    %26 = arith.addf %25, %24 : vector<16x128xf32>
    %27 = arith.mulf %19, %26 : vector<16x128xf32>
    %cst_14 = arith.constant -0.284496725 : f32
    %28 = vector.broadcast %cst_14 : f32 to vector<16x128xf32>
    %29 = arith.addf %28, %27 : vector<16x128xf32>
    %30 = arith.mulf %19, %29 : vector<16x128xf32>
    %cst_15 = arith.constant 0.254829586 : f32
    %31 = vector.broadcast %cst_15 : f32 to vector<16x128xf32>
    %32 = arith.addf %31, %30 : vector<16x128xf32>
    %33 = arith.mulf %19, %32 : vector<16x128xf32>
    %cst_16 = arith.constant 0.000000e+00 : f32
    %34 = vector.broadcast %cst_16 : f32 to vector<16x128xf32>
    %35 = arith.subf %34, %13 : vector<16x128xf32>
    %36 = arith.mulf %35, %13 : vector<16x128xf32>
    %37 = math.exp %36 : vector<16x128xf32>
    %38 = arith.mulf %33, %37 : vector<16x128xf32>
    %cst_17 = arith.constant 1.000000e+00 : f32
    %39 = vector.broadcast %cst_17 : f32 to vector<16x128xf32>
    %40 = arith.subf %39, %38 : vector<16x128xf32>
    %cst_18 = arith.constant 0.000000e+00 : f32
    %41 = vector.broadcast %cst_18 : f32 to vector<16x128xf32>
    %42 = arith.cmpf oge, %12, %41 : vector<16x128xf32>
    %cst_19 = arith.constant 0.000000e+00 : f32
    %43 = vector.broadcast %cst_19 : f32 to vector<16x128xf32>
    %44 = arith.subf %43, %40 : vector<16x128xf32>
    %45 = arith.select %42, %40, %44 : vector<16x128xi1>, vector<16x128xf32>
    %cst_20 = arith.constant 1.000000e+00 : f32
    %46 = vector.broadcast %cst_20 : f32 to vector<16x128xf32>
    %47 = arith.addf %46, %45 : vector<16x128xf32>
    %48 = arith.mulf %10, %47 : vector<16x128xf32>
    %c0_21 = arith.constant 0 : index
    %c0_22 = arith.constant 0 : index
    %49 = vector.load %arg14[%c0_21, %c0_22] : memref<16x32xf32, #tpu.memory_space<vmem>>, vector<16x32xf32>
    %c0_23 = arith.constant 0 : index
    %c0_24 = arith.constant 0 : index
    %50 = vector.load %arg6[%c0_23, %c0_24] : memref<128x32xf32, #tpu.memory_space<vmem>>, vector<128x32xf32>
    %cst_25 = arith.constant dense<0.000000e+00> : vector<16x32xf32>
    %51 = tpu.matmul %48, %50, %cst_25 {dimension_numbers = #tpu.dot_dimension_numbers<[1], [0], [0], [1], [0, 0, 1, 1], [], []>} : vector<16x128xf32>, vector<128x32xf32>, vector<16x32xf32> -> vector<16x32xf32>
    %52 = arith.addf %49, %51 : vector<16x32xf32>
    %c0_26 = arith.constant 0 : index
    %c0_27 = arith.constant 0 : index
    %53 = vector.load %arg14[%c0_26, %c0_27] : memref<16x32xf32, #tpu.memory_space<vmem>>, vector<16x32xf32>
    tpu.vector_store %arg14[%c0_26, %c0_27], %52 {strides = array<i32>} : memref<16x32xf32, #tpu.memory_space<vmem>>, vector<16x32xf32>,
    %c0_i32_28 = arith.constant 0 : i32
    %54 = arith.cmpi eq, %arg1, %c0_i32_28 : i32
    %55 = arith.extui %54 : i1 to i32
    %c0_i32_29 = arith.constant 0 : i32
    %56 = arith.cmpi ne, %55, %c0_i32_29 : i32
    scf.if %56 {
      %c0_30 = arith.constant 0 : index
      %c0_31 = arith.constant 0 : index
      %57 = vector.load %arg14[%c0_30, %c0_31] : memref<16x32xf32, #tpu.memory_space<vmem>>, vector<16x32xf32>
      %c0_32 = arith.constant 0 : index
      %c0_33 = arith.constant 0 : index
      %58 = vector.load %arg7[%c0_32, %c0_33] : memref<1x32xf32, #tpu.memory_space<vmem>>, vector<1x32xf32>
      %59 = vector.broadcast %58 : vector<1x32xf32> to vector<16x32xf32>
      %60 = arith.addf %57, %59 : vector<16x32xf32>
      %c0_34 = arith.constant 0 : index
      %c0_35 = arith.constant 0 : index
      %61 = vector.load %arg13[%c0_34, %c0_35] : memref<16x32xf32, #tpu.memory_space<vmem>>, vector<16x32xf32>
      %62 = arith.addf %61, %60 : vector<16x32xf32>
      %c0_36 = arith.constant 0 : index
      %c0_37 = arith.constant 0 : index
      %63 = vector.load %arg10[%c0_36, %c0_37] : memref<1x32xf32, #tpu.memory_space<vmem>>, vector<1x32xf32>
      %c0_38 = arith.constant 0 : index
      %c0_39 = arith.constant 0 : index
      %64 = vector.load %arg11[%c0_38, %c0_39] : memref<1x32xf32, #tpu.memory_space<vmem>>, vector<1x32xf32>
      %cst_40 = arith.constant dense<0.000000e+00> : vector<16xf32>
      %65 = vector.multi_reduction <add>, %62, %cst_40 [1] : vector<16x32xf32> to vector<16xf32>
      %66 = vector.shape_cast %65 : vector<16xf32> to vector<16x1xf32>
      %cst_41 = arith.constant 3.200000e+01 : f32
      %67 = vector.broadcast %cst_41 : f32 to vector<16x1xf32>
      %68 = arith.divf %66, %67 : vector<16x1xf32>
      %69 = vector.broadcast %68 : vector<16x1xf32> to vector<16x32xf32>
      %70 = arith.subf %62, %69 : vector<16x32xf32>
      %71 = arith.mulf %70, %70 : vector<16x32xf32>
      %cst_42 = arith.constant dense<0.000000e+00> : vector<16xf32>
      %72 = vector.multi_reduction <add>, %71, %cst_42 [1] : vector<16x32xf32> to vector<16xf32>
      %73 = vector.shape_cast %72 : vector<16xf32> to vector<16x1xf32>
      %cst_43 = arith.constant 3.200000e+01 : f32
      %74 = vector.broadcast %cst_43 : f32 to vector<16x1xf32>
      %75 = arith.divf %73, %74 : vector<16x1xf32>
      %cst_44 = arith.constant 9.99999974E-6 : f32
      %76 = vector.broadcast %cst_44 : f32 to vector<16x1xf32>
      %77 = arith.addf %75, %76 : vector<16x1xf32>
      %78 = math.rsqrt %77 : vector<16x1xf32>
      %79 = vector.broadcast %78 : vector<16x1xf32> to vector<16x32xf32>
      %80 = arith.mulf %70, %79 : vector<16x32xf32>
      %81 = vector.broadcast %63 : vector<1x32xf32> to vector<16x32xf32>
      %82 = arith.mulf %80, %81 : vector<16x32xf32>
      %83 = vector.broadcast %64 : vector<1x32xf32> to vector<16x32xf32>
      %84 = arith.addf %82, %83 : vector<16x32xf32>
      %c0_45 = arith.constant 0 : index
      %c0_46 = arith.constant 0 : index
      %85 = vector.load %arg12[%c0_45, %c0_46] : memref<16x32xf32, #tpu.memory_space<vmem>>, vector<16x32xf32>
      tpu.vector_store %arg12[%c0_45, %c0_46], %84 {strides = array<i32>} : memref<16x32xf32, #tpu.memory_space<vmem>>, vector<16x32xf32>,
    } else {
    }
    return
  }
  func.func @transform_0(%arg0: i32, %arg1: i32) -> (i32, i32) {
    %c0_i32 = arith.constant 0 : i32
    %c0_i32_0 = arith.constant 0 : i32
    return %arg0, %c0_i32 : i32, i32
  }
  func.func @transform_1(%arg0: i32, %arg1: i32) -> (i32, i32) {
    %c0_i32 = arith.constant 0 : i32
    %c0_i32_0 = arith.constant 0 : i32
    return %arg0, %c0_i32 : i32, i32
  }
  func.func @transform_2(%arg0: i32, %arg1: i32) -> (i32, i32) {
    %c0_i32 = arith.constant 0 : i32
    %c0_i32_0 = arith.constant 0 : i32
    return %c0_i32, %arg1 : i32, i32
  }
  func.func @transform_3(%arg0: i32, %arg1: i32) -> (i32, i32) {
    %c0_i32 = arith.constant 0 : i32
    %c0_i32_0 = arith.constant 0 : i32
    return %c0_i32, %arg1 : i32, i32
  }
  func.func @transform_4(%arg0: i32, %arg1: i32) -> (i32, i32) {
    %c0_i32 = arith.constant 0 : i32
    %c0_i32_0 = arith.constant 0 : i32
    return %arg1, %c0_i32 : i32, i32
  }
  func.func @transform_5(%arg0: i32, %arg1: i32) -> (i32, i32) {
    %c0_i32 = arith.constant 0 : i32
    %c0_i32_0 = arith.constant 0 : i32
    %c0_i32_1 = arith.constant 0 : i32
    return %c0_i32, %c0_i32_0 : i32, i32
  }
  func.func @transform_6(%arg0: i32, %arg1: i32) -> (i32, i32) {
    %c0_i32 = arith.constant 0 : i32
    %c0_i32_0 = arith.constant 0 : i32
    %c0_i32_1 = arith.constant 0 : i32
    return %c0_i32, %c0_i32_0 : i32, i32
  }
  func.func @transform_7(%arg0: i32, %arg1: i32) -> (i32, i32) {
    %c0_i32 = arith.constant 0 : i32
    %c0_i32_0 = arith.constant 0 : i32
    %c0_i32_1 = arith.constant 0 : i32
    return %c0_i32, %c0_i32_0 : i32, i32
  }
  func.func @transform_8(%arg0: i32, %arg1: i32) -> (i32, i32) {
    %c0_i32 = arith.constant 0 : i32
    %c0_i32_0 = arith.constant 0 : i32
    %c0_i32_1 = arith.constant 0 : i32
    return %c0_i32, %c0_i32_0 : i32, i32
  }
  func.func @transform_9(%arg0: i32, %arg1: i32) -> (i32, i32) {
    %c0_i32 = arith.constant 0 : i32
    %c0_i32_0 = arith.constant 0 : i32
    %c0_i32_1 = arith.constant 0 : i32
    return %c0_i32, %c0_i32_0 : i32, i32
  }
  func.func @transform_10(%arg0: i32, %arg1: i32) -> (i32, i32) {
    %c0_i32 = arith.constant 0 : i32
    %c0_i32_0 = arith.constant 0 : i32
    return %arg0, %c0_i32 : i32, i32
  }
}

</mosaic_0001>

<bundles_post_ra>
// kernel: tpu_custom_call.1
= control target key start
LH: loop header
LB: loop body
LE: loop exit
PB: predicated region body
PF: predicated region fallthrough
CT: control target
= control target key end

     0   :  { %vm48_vm0 = vcmask 261120   ;;  %s665_s0 = inlined_call_operand.vmem [shape: f32[16,32], index: 0, kind: input, shape index: {}]   ;;  %s666_s1 = inlined_call_operand.vmem [shape: f32[16,32], index: 1, kind: input, shape index: {}]   ;;  %s667_s2 = inlined_call_operand.vmem [shape: f32[32,128], index: 2, kind: input, shape index: {}]   ;;  %s668_s3 = inlined_call_operand.vmem [shape: f32[1,128], index: 3, kind: input, shape index: {}]   ;;  %s669_s4 = inlined_call_operand.vmem [shape: f32[128,32], index: 4, kind: input, shape index: {}]   ;;  %s670_s5 = inlined_call_operand.vmem [shape: f32[1,32], index: 5, kind: input, shape index: {}]   ;;  %s671_s6 = inlined_call_operand.vmem [shape: f32[1,32], index: 6, kind: input, shape index: {}]   ;;  %s672_s7 = inlined_call_operand.vmem [shape: f32[1,32], index: 7, kind: input, shape index: {}]   ;;  %s673_s8 = inlined_call_operand.vmem [shape: f32[1,32], index: 8, kind: input, shape index: {}]   ;;  %s674_s9 = inlined_call_operand.vmem [shape: f32[1,32], index: 9, kind: input, shape index: {}]   ;;  %s675_s10 = inlined_call_operand.hbm [shape: f32[16,32], index: 10, kind: output, shape index: {}]  }
   0x1   :  { %v40_v0 = vld [vmem:[%s665_s0] sm:$0xff]  ;;  %v41_v2 = vld [vmem:[%s665_s0 + $0x8] sm:$0xff] }
   0x2   :  { %v42_v1 = vld [vmem:[%s666_s1] sm:$0xff]  ;;  %v43_v4 = vld [vmem:[%s666_s1 + $0x8] sm:$0xff] }
   0x3   :  { %v44_v3 = vadd.f32 %v42_v1, %v40_v0 }
   0x5   :  { %v49_v5 = vsel %vm48_vm0, %v44_v3, 0.0 }
   0x6   :  { %15 = vsyncpa [#allocation5], 0  ;;  %50 = vadd.xlane.f32.xlu0 %v49_v5  ;;  %v45_v6 = vadd.f32 %v43_v4, %v41_v2  ;;  %v450_v8 = vmov 32.0   ;;  %v119_v25 = vld [vmem:[%s667_s2 + $0x18] sm:$0xff]  ;;  %v118_v26 = vld [vmem:[%s667_s2 + $0x10] sm:$0xff]  ;;  %s453_s1 = smov 128  }
   0x7   :  { %406 = vrcp.f32 %v450_v8  ;;  %143 = vmatpush.msra.mxu0 %v119_v25  ;;  %v117_v29 = vld [vmem:[%s667_s2 + $0x8] sm:$0xff]  ;;  %v116_v31 = vld [vmem:[%s667_s2] sm:$0xff]  ;;  %v251_v59 = vld [vmem:[%s669_s4 + $0x78] sm:$0xff]  ;;  %s454_s21 = smov 8  }
   0x8   :  { %v52_v7 = vsel %vm48_vm0, %v45_v6, 0.0  ;;  %v400_v43 = vld [vmem:[%s671_s6] ss:$0 sm:$0xff]  ;;  %252 = vmatpush.msra.mxu1 %v251_v59  ;;  %379 = vmatpush.msra.mxu2 %v251_v59  ;;  %v250_v60 = vld [vmem:[%s669_s4 + $0x70] sm:$0xff]  ;;  %v249_v62 = vld [vmem:[%s669_s4 + $0x68] sm:$0xff] }
   0x9   :  { %144 = vmatpush.msra.mxu0 %v118_v26  ;;  %v401_v46 = vld [vmem:[%s672_s7] ss:$0 sm:$0xff]  ;;  %v247_v1 = vld [vmem:[%s669_s4 + $0x58] sm:$0xff]  ;;  %v245_v5 = vld [vmem:[%s669_s4 + $0x48] sm:$0xff] }
   0xa   :  { %v402_v61 = vld [vmem:[%s668_s3] ss:$0 sm:$0xff]  ;;  %253 = vmatpush.msra.mxu1 %v250_v60  ;;  %380 = vmatpush.msra.mxu2 %v250_v60  ;;  %v237_v26 = vld [vmem:[%s669_s4 + $0x8] sm:$0xff] }
   0xb   :  { %145 = vmatpush.msra.mxu0 %v117_v29  ;;  %v248_v63 = vld [vmem:[%s669_s4 + $0x60] sm:$0xff] }
   0xc   :  { %254 = vmatpush.msra.mxu1 %v249_v62  ;;  %381 = vmatpush.msra.mxu2 %v249_v62  ;;  %v236_v29 = vld [vmem:[%s669_s4] sm:$0xff] }
   0xd   :  { %v407_v9 = vpop.eup %406  ;;  %146 = vmatpush.msra.mxu0 %v116_v31 }
   0xe   :  { %53 = vadd.xlane.f32.xlu0 %v52_v7  ;;  %v56_v10 = vmul.f32 32.0, %v407_v9  ;;  %vm60_vm1 = vweird.f32 %v407_v9  ;;  %255 = vmatpush.msra.mxu1 %v248_v63  ;;  %v244_v7 = vld [vmem:[%s669_s4 + $0x40] sm:$0xff] }
   0xf   :  { %382 = vmatpush.msra.mxu2 %v248_v63 }
  0x10   :  { %v57_v11 = vsub.f32 1.0, %v56_v10  ;;  %256 = vmatpush.msra.mxu1 %v247_v1  ;;  %v243_v10 = vld [vmem:[%s669_s4 + $0x38] sm:$0xff] }
  0x11   :  { %383 = vmatpush.msra.mxu2 %v247_v1 }
  0x12   :  { %v58_v12 = vmul.f32 %v407_v9, %v57_v11 }
  0x14   :  { %v59_v13 = vadd.f32 %v407_v9, %v58_v12 }
  0x16   :  { %v524_v14 = vsel %vm60_vm1, %v407_v9, %v59_v13  ;;  %v242_v13 = vld [vmem:[%s669_s4 + $0x30] sm:$0xff] }
  0x79   :  { %v51_v15 = vpop.xlane.xlu0 %50 }
  0x7a   :  { %v62_v16 = vmul.f32 %v524_v14, %v51_v15 }
  0x7c   :  { %v64_v17 = vsub.f32 %v44_v3, %v62_v16  ;;  %v246_v3 = vld [vmem:[%s669_s4 + $0x50] sm:$0xff]  ;;  %v241_v16 = vld [vmem:[%s669_s4 + $0x28] sm:$0xff] }
  0x7d   :  { %257 = vmatpush.msra.mxu1 %v246_v3  ;;  %384 = vmatpush.msra.mxu2 %v246_v3 }
  0x7e   :  { %v66_v18 = vmul.f32 %v64_v17, %v64_v17 }
  0x7f   :  { %258 = vmatpush.msra.mxu1 %v245_v5  ;;  %385 = vmatpush.msra.mxu2 %v245_v5 }
  0x80   :  { %v68_v19 = vsel %vm48_vm0, %v66_v18, 0.0  ;;  %v240_v18 = vld [vmem:[%s669_s4 + $0x20] sm:$0xff] }
  0x81   :  { %69 = vadd.xlane.f32.xlu1 %v68_v19  ;;  %v54_v20 = vpop.xlane.xlu0 %53  ;;  %259 = vmatpush.msra.mxu1 %v244_v7 }
  0x82   :  { %v63_v21 = vmul.f32 %v524_v14, %v54_v20  ;;  %386 = vmatpush.msra.mxu2 %v244_v7  ;;  %v239_v20 = vld [vmem:[%s669_s4 + $0x18] sm:$0xff] }
  0x83   :  { %260 = vmatpush.msra.mxu1 %v243_v10 }
  0x84   :  { %v65_v22 = vsub.f32 %v45_v6, %v63_v21  ;;  %387 = vmatpush.msra.mxu2 %v243_v10 }
  0x85   :  { %261 = vmatpush.msra.mxu1 %v242_v13 }
  0x86   :  { %v67_v23 = vmul.f32 %v65_v22, %v65_v22  ;;  %388 = vmatpush.msra.mxu2 %v242_v13 }
  0x87   :  { %262 = vmatpush.msra.mxu1 %v241_v16 }
  0x88   :  { %v71_v24 = vsel %vm48_vm0, %v67_v23, 0.0  ;;  %389 = vmatpush.msra.mxu2 %v241_v16 }
  0x89   :  { %72 = vadd.xlane.f32.xlu1 %v71_v24  ;;  %263 = vmatpush.msra.mxu1 %v240_v18  ;;  %v238_v24 = vld [vmem:[%s669_s4 + $0x10] sm:$0xff] }
  0x8a   :  { %390 = vmatpush.msra.mxu2 %v240_v18 }
  0x8b   :  { %264 = vmatpush.msra.mxu1 %v239_v20 }
  0x8c   :  { %391 = vmatpush.msra.mxu2 %v239_v20 }
  0x8d   :  { %265 = vmatpush.msra.mxu1 %v238_v24 }
  0x8e   :  { %392 = vmatpush.msra.mxu2 %v238_v24 }
  0x8f   :  { %266 = vmatpush.msra.mxu1 %v237_v26 }
  0x90   :  { %393 = vmatpush.msra.mxu2 %v237_v26 }
  0x91   :  { %267 = vmatpush.msra.mxu1 %v236_v29 }
  0x92   :  { %394 = vmatpush.msra.mxu2 %v236_v29 }
  0xf4   :  { %v70_v27 = vpop.xlane.xlu1 %69 }
  0xf5   :  { %v74_v28 = vmul.f32 %v70_v27, %v524_v14 }
  0xf7   :  { %v76_v30 = vadd.f32 1e-05, %v74_v28 }
  0xf9   :  { %408 = vrsqrt.f32 %v76_v30  ;;  %vm84_vm3 = vweird.f32 %v76_v30 }
  0xfc   :  { %v73_v32 = vpop.xlane.xlu1 %72 }
  0xfd   :  { %v75_v33 = vmul.f32 %v73_v32, %v524_v14 }
  0xff   :  { %v409_v34 = vpop.eup %408  ;;  %v77_v35 = vadd.f32 1e-05, %v75_v33 }
 0x100   :  { %v79_v36 = vmul.f32 %v409_v34, %v76_v30  ;;  %vm85_vm2 = vweird.f32 %v409_v34 }
 0x101   :  { %410 = vrsqrt.f32 %v77_v35  ;;  %vm86_vm4 = vmor %vm84_vm3, %vm85_vm2  ;;  %vm94_vm6 = vweird.f32 %v77_v35 }
 0x102   :  { %v80_v37 = vmul.f32 %v409_v34, %v79_v36 }
 0x104   :  { %v81_v38 = vmul.f32 0.5, %v80_v37 }
 0x106   :  { %v82_v39 = vsub.f32 1.5, %v81_v38 }
 0x107   :  { %v411_v40 = vpop.eup %410 }
 0x108   :  { %v83_v41 = vmul.f32 %v409_v34, %v82_v39  ;;  %v89_v42 = vmul.f32 %v411_v40, %v77_v35  ;;  %vm95_vm5 = vweird.f32 %v411_v40 }
 0x109   :  { %vm96_vm7 = vmor %vm94_vm6, %vm95_vm5 }
 0x10a   :  { %v87_v44 = vsel %vm86_vm4, %v409_v34, %v83_v41  ;;  %v90_v45 = vmul.f32 %v411_v40, %v89_v42 }
 0x10b   :  { %v98_v47 = vmul.f32 %v87_v44, %v64_v17 }
 0x10c   :  { %v91_v48 = vmul.f32 0.5, %v90_v45 }
 0x10d   :  { %v103_v49 = vmul.f32 %v400_v43, %v98_v47 }
 0x10e   :  { %v92_v50 = vsub.f32 1.5, %v91_v48 }
 0x10f   :  { %v108_v51 = vadd.f32 %v401_v46, %v103_v49 }
 0x110   :  { %v93_v52 = vmul.f32 %v411_v40, %v92_v50 }
 0x111   :  { %110 = vst.msk [vmem:[#allocation2] sm:$0xff] %vm48_vm0, %v108_v51  ;;  %v451_v51 = vmov 0.0  }
 0x112   :  { %v97_v53 = vsel %vm96_vm7, %v411_v40, %v93_v52  ;;  %112 = vst.msk [vmem:[#allocation3] sm:$0xff] %vm48_vm0, %v451_v51 }
 0x113   :  { %v99_v54 = vmul.f32 %v97_v53, %v65_v22  ;;  %113 = vst.msk [vmem:[#allocation3 + $0x8] sm:$0xff] %vm48_vm0, %v451_v51 }
 0x115   :  { %v104_v55 = vmul.f32 %v400_v43, %v99_v54 }
 0x117   :  { %v109_v56 = vadd.f32 %v401_v46, %v104_v55 }
 0x118   :  { %v551_v57 = vld [vmem:[#allocation2] sm:$0xff] }
 0x119   :  { %111 = vst.msk [vmem:[#allocation2 + $0x8] sm:$0xff] %vm48_vm0, %v109_v56  ;;  %377 = vmatmul.msk.f32.vlgmr.msra.gmra.mxu0 %vm48_vm0, %v551_v57 }
 0x120   :  { %v556_v58 = vld [vmem:[#allocation2 + $0x8] sm:$0xff] }
 0x121   :  { %378 = vmatmul.msk.f32.gmra.mxu0 %vm48_vm0, %v556_v58 }
 0x196   :  { %v148_v0 = vpop.f32.mrf.mxu0 }
 0x197   :  { %v578_v2 = vadd.f32 %v402_v61, %v148_v0 }
 0x199   :  { %v584_v4 = vmul.f32 0.70710677, %v578_v2 }
 0x19b   :  { %v590_v6 = vand.u32 2147483647, %v584_v4  ;;  %vm224_vm1 = vcmp.ge.f32.partialorder %v584_v4, 0.0  ;;  %v234_v4 = vld [vmem:[#allocation3] sm:$0xff] }
 0x19d   :  { %v160_v8 = vmul.f32 0.3275911, %v590_v6  ;;  %v212_v35 = vsub.f32 0.0, %v590_v6 }
 0x19e   :  { %v151_v9 = vpop.f32.mrf.mxu0 }
 0x19f   :  { %v162_v11 = vadd.f32 1.0, %v160_v8  ;;  %v599_v12 = vadd.f32 %v402_v61, %v151_v9  ;;  %v214_v42 = vmul.f32 %v212_v35, %v590_v6 }
 0x1a1   :  { %412 = vrcp.f32 %v162_v11  ;;  %v605_v15 = vmul.f32 0.70710677, %v599_v12  ;;  %v175_v27 = vand.u32 2147483648, %v162_v11  ;;  %v173_v30 = vand.u32 2147483647, %v162_v11 }
 0x1a2   :  { %vm169_vm9 = vweird.f32 %v162_v11  ;;  %v216_v49 = vmul.f32 1.442695, %v214_v42  ;;  %v155_v26 = vmul.f32 0.5, %v599_v12 }
 0x1a3   :  { %v611_v17 = vand.u32 2147483647, %v605_v15  ;;  %v176_v32 = vor.u32 1.1754944e-38, %v175_v27  ;;  %vm174_vm11 = vcmp.eq.f32.partialorder %v173_v30, 8.507059e+37  ;;  %vm225_vm2 = vcmp.ge.f32.partialorder %v605_v15, 0.0 }
 0x1a5   :  { %v161_v19 = vmul.f32 0.3275911, %v611_v17  ;;  %v213_v52 = vsub.f32 0.0, %v611_v17 }
 0x1a7   :  { %v413_v21 = vpop.eup %412  ;;  %v163_v23 = vadd.f32 1.0, %v161_v19  ;;  %v215_v60 = vmul.f32 %v213_v52, %v611_v17  ;;  %v154_v17 = vmul.f32 0.5, %v578_v2  ;;  %v403_v2 = vld [vmem:[%s670_s5] ss:$0 sm:$0xff] }
 0x1a8   :  { %v165_v22 = vmul.f32 %v413_v21, %v162_v11  ;;  %vm170_vm8 = vweird.f32 %v413_v21 }
 0x1a9   :  { %414 = vrcp.f32 %v163_v23  ;;  %vm171_vm10 = vmor %vm169_vm9, %vm170_vm8  ;;  %v190_v41 = vand.u32 2147483648, %v163_v23  ;;  %v188_v44 = vand.u32 2147483647, %v163_v23  ;;  %vm184_vm13 = vweird.f32 %v163_v23 }
 0x1aa   :  { %v166_v25 = vsub.f32 1.0, %v165_v22  ;;  %416 = vpow2.f32 %v216_v49  ;;  %v218_v1 = vmul.f32 1.442695, %v215_v60 }
 0x1ab   :  { %v191_v48 = vor.u32 1.1754944e-38, %v190_v41  ;;  %vm189_vm15 = vcmp.eq.f32.partialorder %v188_v44, 8.507059e+37 }
 0x1ac   :  { %v167_v28 = vmul.f32 %v413_v21, %v166_v25  ;;  %418 = vpow2.f32 %v218_v1  ;;  %v405_v1 = vld [vmem:[%s674_s9] ss:$0 sm:$0xff]  ;;  %s365_s9 = sshll.u32 %s675_s10, 4  ;;  %s366_s9 = int_to_ptr.hbm [resolvable:$true] %s365_s9 }
 0x1ae   :  { %v168_v31 = vadd.f32 %v413_v21, %v167_v28 }
 0x1af   :  { %v415_v33 = vpop.eup %414 }
 0x1b0   :  { %v172_v34 = vsel %vm171_vm10, %v413_v21, %v168_v31  ;;  %v180_v36 = vmul.f32 %v415_v33, %v163_v23  ;;  %vm185_vm12 = vweird.f32 %v415_v33  ;;  %v417_v5 = vpop.eup %416 }
 0x1b1   :  { %v177_v37 = vsel %vm174_vm11, %v176_v32, %v172_v34  ;;  %vm186_vm14 = vmor %vm184_vm13, %vm185_vm12 }
 0x1b2   :  { %v194_v38 = vmul.f32 1.0614054, %v177_v37  ;;  %v181_v39 = vsub.f32 1.0, %v180_v36  ;;  %v419_v20 = vpop.eup %418 }
 0x1b4   :  { %v196_v40 = vadd.f32 -1.4531521, %v194_v38  ;;  %v182_v43 = vmul.f32 %v415_v33, %v181_v39 }
 0x1b6   :  { %v198_v45 = vmul.f32 %v196_v40, %v177_v37  ;;  %v183_v46 = vadd.f32 %v415_v33, %v182_v43 }
 0x1b8   :  { %v200_v47 = vadd.f32 1.4214138, %v198_v45  ;;  %v187_v50 = vsel %vm186_vm14, %v415_v33, %v183_v46  ;;  %v235_v33 = vld [vmem:[#allocation3 + $0x8] sm:$0xff] }
 0x1b9   :  { %v192_v54 = vsel %vm189_vm15, %v191_v48, %v187_v50 }
 0x1ba   :  { %v202_v53 = vmul.f32 %v200_v47, %v177_v37  ;;  %v195_v55 = vmul.f32 1.0614054, %v192_v54 }
 0x1bc   :  { %v204_v56 = vadd.f32 -0.28449672, %v202_v53  ;;  %v197_v59 = vadd.f32 -1.4531521, %v195_v55 }
 0x1be   :  { %v206_v61 = vmul.f32 %v204_v56, %v177_v37  ;;  %v199_v62 = vmul.f32 %v197_v59, %v192_v54 }
 0x1c0   :  { %v208_v63 = vadd.f32 0.2548296, %v206_v61  ;;  %v201_v0 = vadd.f32 1.4214138, %v199_v62  ;;  %v404_v62 = vld [vmem:[%s673_s8] ss:$0 sm:$0xff] }
 0x1c1   :  { %s452_s8 = smov [#allocation4]  }
 0x1c2   :  { %v210_v3 = vmul.f32 %v208_v63, %v177_v37  ;;  %v203_v6 = vmul.f32 %v201_v0, %v192_v54  ;;  %s363_s3 = sshll.u32 %s452_s8, 4  ;;  %s364_s3 = int_to_ptr.vmem [resolvable:$true] %s363_s3 }
 0x1c4   :  { %v220_v7 = vmul.f32 %v417_v5, %v210_v3  ;;  %v205_v8 = vadd.f32 -0.28449672, %v203_v6 }
 0x1c6   :  { %v222_v9 = vsub.f32 1.0, %v220_v7  ;;  %v207_v10 = vmul.f32 %v205_v8, %v192_v54 }
 0x1c8   :  { %v226_v11 = vsub.f32 0.0, %v222_v9  ;;  %v209_v13 = vadd.f32 0.2548296, %v207_v10 }
 0x1ca   :  { %v228_v16 = vsel %vm224_vm1, %v222_v9, %v226_v11  ;;  %v211_v19 = vmul.f32 %v209_v13, %v192_v54 }
 0x1cb   :  { %v230_v18 = vadd.f32 1.0, %v228_v16 }
 0x1cc   :  { %v221_v22 = vmul.f32 %v419_v20, %v211_v19 }
 0x1cd   :  { %v232_v21 = vmul.f32 %v230_v18, %v154_v17 }
 0x1ce   :  { %v223_v23 = vsub.f32 1.0, %v221_v22 }
 0x1cf   :  { %268 = vmatmul.f32.vlgmr.msra.gmra.mxu1 %v232_v21 }
 0x1d0   :  { %v227_v24 = vsub.f32 0.0, %v223_v23 }
 0x1d2   :  { %v229_v25 = vsel %vm225_vm2, %v223_v23, %v227_v24 }
 0x1d3   :  { %v231_v27 = vadd.f32 1.0, %v229_v25 }
 0x1d5   :  { %v233_v28 = vmul.f32 %v231_v27, %v155_v26 }
 0x1d7   :  { %271 = vmatmul.f32.vlgmr.msra.gmra.mxu2 %v233_v28 }
 0x24c   :  { %v269_v29 = vpop.f32.mrf.mxu1 }
 0x24d   :  { %v275_v30 = vadd.f32 %v269_v29, %v234_v4 }
 0x24f   :  { %277 = vst.msk [vmem:[#allocation3] sm:$0xff] %vm48_vm0, %v275_v30 }
 0x256   :  { %v282_v31 = vld [vmem:[#allocation3] sm:$0xff] }
 0x257   :  { %v288_v32 = vadd.f32 %v403_v2, %v282_v31 }
 0x259   :  { %v292_v15 = vadd.f32 %v288_v32, %v551_v57 }
 0x25a   :  { %v272_v34 = vpop.f32.mrf.mxu2 }
 0x25b   :  { %v296_v12 = vsel %vm48_vm0, %v292_v15, 0.0  ;;  %v276_v35 = vadd.f32 %v272_v34, %v235_v33 }
 0x25c   :  { %297 = vadd.xlane.f32.xlu2 %v296_v12 }
 0x25d   :  { %278 = vst.msk [vmem:[#allocation3 + $0x8] sm:$0xff] %vm48_vm0, %v276_v35 }
 0x264   :  { %v283_v36 = vld [vmem:[#allocation3 + $0x8] sm:$0xff] }
 0x265   :  { %v289_v37 = vadd.f32 %v403_v2, %v283_v36 }
 0x267   :  { %v293_v38 = vadd.f32 %v289_v37, %v556_v58 }
 0x269   :  { %v299_v39 = vsel %vm48_vm0, %v293_v38, 0.0 }
 0x26a   :  { %300 = vadd.xlane.f32.xlu2 %v299_v39 }
 0x2cf   :  { %v298_v40 = vpop.xlane.xlu2 %297 }
 0x2d0   :  { %v309_v41 = vmul.f32 %v298_v40, %v524_v14 }
 0x2d2   :  { %v311_v42 = vsub.f32 %v292_v15, %v309_v41 }
 0x2d4   :  { %v313_v43 = vmul.f32 %v311_v42, %v311_v42 }
 0x2d6   :  { %v315_v57 = vsel %vm48_vm0, %v313_v43, 0.0 }
 0x2d7   :  { %316 = vadd.xlane.f32.xlu0 %v315_v57 }
 0x2dd   :  { %v301_v44 = vpop.xlane.xlu2 %300 }
 0x2de   :  { %v310_v45 = vmul.f32 %v301_v44, %v524_v14 }
 0x2e0   :  { %v312_v46 = vsub.f32 %v293_v38, %v310_v45 }
 0x2e2   :  { %v314_v47 = vmul.f32 %v312_v46, %v312_v46 }
 0x2e4   :  { %v318_v48 = vsel %vm48_vm0, %v314_v47, 0.0 }
 0x2e5   :  { %319 = vadd.xlane.f32.xlu1 %v318_v48 }
 0x34a   :  { %v317_v58 = vpop.xlane.xlu0 %316 }
 0x34b   :  { %v321_v49 = vmul.f32 %v317_v58, %v524_v14 }
 0x34d   :  { %v323_v50 = vadd.f32 1e-05, %v321_v49 }
 0x34f   :  { %420 = vrsqrt.f32 %v323_v50  ;;  %vm331_vm4 = vweird.f32 %v323_v50 }
 0x355   :  { %v421_v51 = vpop.eup %420 }
 0x356   :  { %v326_v52 = vmul.f32 %v421_v51, %v323_v50  ;;  %vm332_vm3 = vweird.f32 %v421_v51 }
 0x357   :  { %vm333_vm5 = vmor %vm331_vm4, %vm332_vm3 }
 0x358   :  { %v327_v53 = vmul.f32 %v421_v51, %v326_v52  ;;  %v320_v54 = vpop.xlane.xlu1 %319 }
 0x359   :  { %v322_v56 = vmul.f32 %v320_v54, %v524_v14 }
 0x35a   :  { %v328_v55 = vmul.f32 0.5, %v327_v53 }
 0x35b   :  { %v324_v60 = vadd.f32 1e-05, %v322_v56 }
 0x35c   :  { %v329_v59 = vsub.f32 1.5, %v328_v55 }
 0x35d   :  { %422 = vrsqrt.f32 %v324_v60  ;;  %vm341_vm7 = vweird.f32 %v324_v60 }
 0x35e   :  { %v330_v61 = vmul.f32 %v421_v51, %v329_v59 }
 0x360   :  { %v334_v63 = vsel %vm333_vm5, %v421_v51, %v330_v61 }
 0x361   :  { %v345_v0 = vmul.f32 %v334_v63, %v311_v42 }
 0x363   :  { %v350_v3 = vmul.f32 %v404_v62, %v345_v0  ;;  %v423_v5 = vpop.eup %422 }
 0x364   :  { %v336_v14 = vmul.f32 %v423_v5, %v324_v60  ;;  %vm342_vm6 = vweird.f32 %v423_v5 }
 0x365   :  { %v355_v6 = vadd.f32 %v405_v1, %v350_v3  ;;  %vm343_vm8 = vmor %vm341_vm7, %vm342_vm6 }
 0x366   :  { %v337_v7 = vmul.f32 %v423_v5, %v336_v14 }
 0x367   :  { %357 = vst.msk [vmem:[#allocation4] sm:$0xff] %vm48_vm0, %v355_v6 }
 0x368   :  { %v338_v8 = vmul.f32 0.5, %v337_v7 }
 0x36a   :  { %v339_v9 = vsub.f32 1.5, %v338_v8 }
 0x36c   :  { %v340_v10 = vmul.f32 %v423_v5, %v339_v9 }
 0x36e   :  { %v344_v11 = vsel %vm343_vm8, %v423_v5, %v340_v10 }
 0x36f   :  { %v346_v13 = vmul.f32 %v344_v11, %v312_v46 }
 0x371   :  { %v351_v16 = vmul.f32 %v404_v62, %v346_v13 }
 0x373   :  { %v356_v17 = vadd.f32 %v405_v1, %v351_v16 }
 0x375   :  { %358 = vst.msk [vmem:[#allocation4 + $0x8] sm:$0xff] %vm48_vm0, %v356_v17 }
 0x376   :  { %371 = dma.vmem_to_hbm [thread:$0]  %s364_s3, 256, %s366_s9, [#allocation5], %s453_s1, %s453_s1, %s454_s21  }
 0x377   :  { %448 = dma.done.wait [#allocation5], 256  }
 0x378   :  { %449 = vsyncadd [#allocation5], 4294967040 }
 0x379   :  { %376 = vsyncpa [#allocation5], 1 }

// kernel: tpu_custom_call.1
= control target key start
LH: loop header
LB: loop body
LE: loop exit
PB: predicated region body
PF: predicated region fallthrough
CT: control target
= control target key end

     0   :  { %vm48_vm0 = vcmask 261120   ;;  %s665_s0 = inlined_call_operand.vmem [shape: f32[16,32], index: 0, kind: input, shape index: {}]   ;;  %s666_s1 = inlined_call_operand.vmem [shape: f32[16,32], index: 1, kind: input, shape index: {}]   ;;  %s667_s2 = inlined_call_operand.vmem [shape: f32[32,128], index: 2, kind: input, shape index: {}]   ;;  %s668_s3 = inlined_call_operand.vmem [shape: f32[1,128], index: 3, kind: input, shape index: {}]   ;;  %s669_s4 = inlined_call_operand.vmem [shape: f32[128,32], index: 4, kind: input, shape index: {}]   ;;  %s670_s5 = inlined_call_operand.vmem [shape: f32[1,32], index: 5, kind: input, shape index: {}]   ;;  %s671_s6 = inlined_call_operand.vmem [shape: f32[1,32], index: 6, kind: input, shape index: {}]   ;;  %s672_s7 = inlined_call_operand.vmem [shape: f32[1,32], index: 7, kind: input, shape index: {}]   ;;  %s673_s8 = inlined_call_operand.vmem [shape: f32[1,32], index: 8, kind: input, shape index: {}]   ;;  %s674_s9 = inlined_call_operand.vmem [shape: f32[1,32], index: 9, kind: input, shape index: {}]   ;;  %s675_s10 = inlined_call_operand.hbm [shape: f32[16,32], index: 10, kind: output, shape index: {}]  }
   0x1   :  { %v40_v0 = vld [vmem:[%s665_s0] sm:$0xff]  ;;  %v41_v2 = vld [vmem:[%s665_s0 + $0x8] sm:$0xff] }
   0x2   :  { %v42_v1 = vld [vmem:[%s666_s1] sm:$0xff]  ;;  %v43_v4 = vld [vmem:[%s666_s1 + $0x8] sm:$0xff] }
   0x3   :  { %v44_v3 = vadd.f32 %v42_v1, %v40_v0 }
   0x5   :  { %v49_v5 = vsel %vm48_vm0, %v44_v3, 0.0 }
   0x6   :  { %15 = vsyncpa [#allocation5], 0  ;;  %50 = vadd.xlane.f32.xlu0 %v49_v5  ;;  %v45_v6 = vadd.f32 %v43_v4, %v41_v2  ;;  %v450_v8 = vmov 32.0   ;;  %v119_v25 = vld [vmem:[%s667_s2 + $0x18] sm:$0xff]  ;;  %v118_v26 = vld [vmem:[%s667_s2 + $0x10] sm:$0xff]  ;;  %s453_s1 = smov 128  }
   0x7   :  { %406 = vrcp.f32 %v450_v8  ;;  %143 = vmatpush.msra.mxu0 %v119_v25  ;;  %v117_v29 = vld [vmem:[%s667_s2 + $0x8] sm:$0xff]  ;;  %v116_v31 = vld [vmem:[%s667_s2] sm:$0xff]  ;;  %v251_v59 = vld [vmem:[%s669_s4 + $0x78] sm:$0xff]  ;;  %s454_s21 = smov 8  }
   0x8   :  { %v52_v7 = vsel %vm48_vm0, %v45_v6, 0.0  ;;  %v400_v43 = vld [vmem:[%s671_s6] ss:$0 sm:$0xff]  ;;  %252 = vmatpush.msra.mxu1 %v251_v59  ;;  %379 = vmatpush.msra.mxu2 %v251_v59  ;;  %v250_v60 = vld [vmem:[%s669_s4 + $0x70] sm:$0xff]  ;;  %v249_v62 = vld [vmem:[%s669_s4 + $0x68] sm:$0xff] }
   0x9   :  { %144 = vmatpush.msra.mxu0 %v118_v26  ;;  %v401_v46 = vld [vmem:[%s672_s7] ss:$0 sm:$0xff]  ;;  %v247_v1 = vld [vmem:[%s669_s4 + $0x58] sm:$0xff]  ;;  %v245_v5 = vld [vmem:[%s669_s4 + $0x48] sm:$0xff] }
   0xa   :  { %v402_v61 = vld [vmem:[%s668_s3] ss:$0 sm:$0xff]  ;;  %253 = vmatpush.msra.mxu1 %v250_v60  ;;  %380 = vmatpush.msra.mxu2 %v250_v60  ;;  %v237_v26 = vld [vmem:[%s669_s4 + $0x8] sm:$0xff] }
   0xb   :  { %145 = vmatpush.msra.mxu0 %v117_v29  ;;  %v248_v63 = vld [vmem:[%s669_s4 + $0x60] sm:$0xff] }
   0xc   :  { %254 = vmatpush.msra.mxu1 %v249_v62  ;;  %381 = vmatpush.msra.mxu2 %v249_v62  ;;  %v236_v29 = vld [vmem:[%s669_s4] sm:$0xff] }
   0xd   :  { %v407_v9 = vpop.eup %406  ;;  %146 = vmatpush.msra.mxu0 %v116_v31 }
   0xe   :  { %53 = vadd.xlane.f32.xlu0 %v52_v7  ;;  %v56_v10 = vmul.f32 32.0, %v407_v9  ;;  %vm60_vm1 = vweird.f32 %v407_v9  ;;  %255 = vmatpush.msra.mxu1 %v248_v63  ;;  %v244_v7 = vld [vmem:[%s669_s4 + $0x40] sm:$0xff] }
   0xf   :  { %382 = vmatpush.msra.mxu2 %v248_v63 }
  0x10   :  { %v57_v11 = vsub.f32 1.0, %v56_v10  ;;  %256 = vmatpush.msra.mxu1 %v247_v1  ;;  %v243_v10 = vld [vmem:[%s669_s4 + $0x38] sm:$0xff] }
  0x11   :  { %383 = vmatpush.msra.mxu2 %v247_v1 }
  0x12   :  { %v58_v12 = vmul.f32 %v407_v9, %v57_v11 }
  0x14   :  { %v59_v13 = vadd.f32 %v407_v9, %v58_v12 }
  0x16   :  { %v524_v14 = vsel %vm60_vm1, %v407_v9, %v59_v13  ;;  %v242_v13 = vld [vmem:[%s669_s4 + $0x30] sm:$0xff] }
  0x79   :  { %v51_v15 = vpop.xlane.xlu0 %50 }
  0x7a   :  { %v62_v16 = vmul.f32 %v524_v14, %v51_v15 }
  0x7c   :  { %v64_v17 = vsub.f32 %v44_v3, %v62_v16  ;;  %v246_v3 = vld [vmem:[%s669_s4 + $0x50] sm:$0xff]  ;;  %v241_v16 = vld [vmem:[%s669_s4 + $0x28] sm:$0xff] }
  0x7d   :  { %257 = vmatpush.msra.mxu1 %v246_v3  ;;  %384 = vmatpush.msra.mxu2 %v246_v3 }
  0x7e   :  { %v66_v18 = vmul.f32 %v64_v17, %v64_v17 }
  0x7f   :  { %258 = vmatpush.msra.mxu1 %v245_v5  ;;  %385 = vmatpush.msra.mxu2 %v245_v5 }
  0x80   :  { %v68_v19 = vsel %vm48_vm0, %v66_v18, 0.0  ;;  %v240_v18 = vld [vmem:[%s669_s4 + $0x20] sm:$0xff] }
  0x81   :  { %69 = vadd.xlane.f32.xlu1 %v68_v19  ;;  %v54_v20 = vpop.xlane.xlu0 %53  ;;  %259 = vmatpush.msra.mxu1 %v244_v7 }
  0x82   :  { %v63_v21 = vmul.f32 %v524_v14, %v54_v20  ;;  %386 = vmatpush.msra.mxu2 %v244_v7  ;;  %v239_v20 = vld [vmem:[%s669_s4 + $0x18] sm:$0xff] }
  0x83   :  { %260 = vmatpush.msra.mxu1 %v243_v10 }
  0x84   :  { %v65_v22 = vsub.f32 %v45_v6, %v63_v21  ;;  %387 = vmatpush.msra.mxu2 %v243_v10 }
  0x85   :  { %261 = vmatpush.msra.mxu1 %v242_v13 }
  0x86   :  { %v67_v23 = vmul.f32 %v65_v22, %v65_v22  ;;  %388 = vmatpush.msra.mxu2 %v242_v13 }
  0x87   :  { %262 = vmatpush.msra.mxu1 %v241_v16 }
  0x88   :  { %v71_v24 = vsel %vm48_vm0, %v67_v23, 0.0  ;;  %389 = vmatpush.msra.mxu2 %v241_v16 }
  0x89   :  { %72 = vadd.xlane.f32.xlu1 %v71_v24  ;;  %263 = vmatpush.msra.mxu1 %v240_v18  ;;  %v238_v24 = vld [vmem:[%s669_s4 + $0x10] sm:$0xff] }
  0x8a   :  { %390 = vmatpush.msra.mxu2 %v240_v18 }
  0x8b   :  { %264 = vmatpush.msra.mxu1 %v239_v20 }
  0x8c   :  { %391 = vmatpush.msra.mxu2 %v239_v20 }
  0x8d   :  { %265 = vmatpush.msra.mxu1 %v238_v24 }
  0x8e   :  { %392 = vmatpush.msra.mxu2 %v238_v24 }
  0x8f   :  { %266 = vmatpush.msra.mxu1 %v237_v26 }
  0x90   :  { %393 = vmatpush.msra.mxu2 %v237_v26 }
  0x91   :  { %267 = vmatpush.msra.mxu1 %v236_v29 }
  0x92   :  { %394 = vmatpush.msra.mxu2 %v236_v29 }
  0xf4   :  { %v70_v27 = vpop.xlane.xlu1 %69 }
  0xf5   :  { %v74_v28 = vmul.f32 %v70_v27, %v524_v14 }
  0xf7   :  { %v76_v30 = vadd.f32 1e-05, %v74_v28 }
  0xf9   :  { %408 = vrsqrt.f32 %v76_v30  ;;  %vm84_vm3 = vweird.f32 %v76_v30 }
  0xfc   :  { %v73_v32 = vpop.xlane.xlu1 %72 }
  0xfd   :  { %v75_v33 = vmul.f32 %v73_v32, %v524_v14 }
  0xff   :  { %v409_v34 = vpop.eup %408  ;;  %v77_v35 = vadd.f32 1e-05, %v75_v33 }
 0x100   :  { %v79_v36 = vmul.f32 %v409_v34, %v76_v30  ;;  %vm85_vm2 = vweird.f32 %v409_v34 }
 0x101   :  { %410 = vrsqrt.f32 %v77_v35  ;;  %vm86_vm4 = vmor %vm84_vm3, %vm85_vm2  ;;  %vm94_vm6 = vweird.f32 %v77_v35 }
 0x102   :  { %v80_v37 = vmul.f32 %v409_v34, %v79_v36 }
 0x104   :  { %v81_v38 = vmul.f32 0.5, %v80_v37 }
 0x106   :  { %v82_v39 = vsub.f32 1.5, %v81_v38 }
 0x107   :  { %v411_v40 = vpop.eup %410 }
 0x108   :  { %v83_v41 = vmul.f32 %v409_v34, %v82_v39  ;;  %v89_v42 = vmul.f32 %v411_v40, %v77_v35  ;;  %vm95_vm5 = vweird.f32 %v411_v40 }
 0x109   :  { %vm96_vm7 = vmor %vm94_vm6, %vm95_vm5 }
 0x10a   :  { %v87_v44 = vsel %vm86_vm4, %v409_v34, %v83_v41  ;;  %v90_v45 = vmul.f32 %v411_v40, %v89_v42 }
 0x10b   :  { %v98_v47 = vmul.f32 %v87_v44, %v64_v17 }
 0x10c   :  { %v91_v48 = vmul.f32 0.5, %v90_v45 }
 0x10d   :  { %v103_v49 = vmul.f32 %v400_v43, %v98_v47 }
 0x10e   :  { %v92_v50 = vsub.f32 1.5, %v91_v48 }
 0x10f   :  { %v108_v51 = vadd.f32 %v401_v46, %v103_v49 }
 0x110   :  { %v93_v52 = vmul.f32 %v411_v40, %v92_v50 }
 0x111   :  { %110 = vst.msk [vmem:[#allocation2] sm:$0xff] %vm48_vm0, %v108_v51  ;;  %v451_v51 = vmov 0.0  }
 0x112   :  { %v97_v53 = vsel %vm96_vm7, %v411_v40, %v93_v52  ;;  %112 = vst.msk [vmem:[#allocation3] sm:$0xff] %vm48_vm0, %v451_v51 }
 0x113   :  { %v99_v54 = vmul.f32 %v97_v53, %v65_v22  ;;  %113 = vst.msk [vmem:[#allocation3 + $0x8] sm:$0xff] %vm48_vm0, %v451_v51 }
 0x115   :  { %v104_v55 = vmul.f32 %v400_v43, %v99_v54 }
 0x117   :  { %v109_v56 = vadd.f32 %v401_v46, %v104_v55 }
 0x118   :  { %v551_v57 = vld [vmem:[#allocation2] sm:$0xff] }
 0x119   :  { %111 = vst.msk [vmem:[#allocation2 + $0x8] sm:$0xff] %vm48_vm0, %v109_v56  ;;  %377 = vmatmul.msk.f32.vlgmr.msra.gmra.mxu0 %vm48_vm0, %v551_v57 }
 0x120   :  { %v556_v58 = vld [vmem:[#allocation2 + $0x8] sm:$0xff] }
 0x121   :  { %378 = vmatmul.msk.f32.gmra.mxu0 %vm48_vm0, %v556_v58 }
 0x196   :  { %v148_v0 = vpop.f32.mrf.mxu0 }
 0x197   :  { %v578_v2 = vadd.f32 %v402_v61, %v148_v0 }
 0x199   :  { %v584_v4 = vmul.f32 0.70710677, %v578_v2 }
 0x19b   :  { %v590_v6 = vand.u32 2147483647, %v584_v4  ;;  %vm224_vm1 = vcmp.ge.f32.partialorder %v584_v4, 0.0  ;;  %v234_v4 = vld [vmem:[#allocation3] sm:$0xff] }
 0x19d   :  { %v160_v8 = vmul.f32 0.3275911, %v590_v6  ;;  %v212_v35 = vsub.f32 0.0, %v590_v6 }
 0x19e   :  { %v151_v9 = vpop.f32.mrf.mxu0 }
 0x19f   :  { %v162_v11 = vadd.f32 1.0, %v160_v8  ;;  %v599_v12 = vadd.f32 %v402_v61, %v151_v9  ;;  %v214_v42 = vmul.f32 %v212_v35, %v590_v6 }
 0x1a1   :  { %412 = vrcp.f32 %v162_v11  ;;  %v605_v15 = vmul.f32 0.70710677, %v599_v12  ;;  %v175_v27 = vand.u32 2147483648, %v162_v11  ;;  %v173_v30 = vand.u32 2147483647, %v162_v11 }
 0x1a2   :  { %vm169_vm9 = vweird.f32 %v162_v11  ;;  %v216_v49 = vmul.f32 1.442695, %v214_v42  ;;  %v155_v26 = vmul.f32 0.5, %v599_v12 }
 0x1a3   :  { %v611_v17 = vand.u32 2147483647, %v605_v15  ;;  %v176_v32 = vor.u32 1.1754944e-38, %v175_v27  ;;  %vm174_vm11 = vcmp.eq.f32.partialorder %v173_v30, 8.507059e+37  ;;  %vm225_vm2 = vcmp.ge.f32.partialorder %v605_v15, 0.0 }
 0x1a5   :  { %v161_v19 = vmul.f32 0.3275911, %v611_v17  ;;  %v213_v52 = vsub.f32 0.0, %v611_v17 }
 0x1a7   :  { %v413_v21 = vpop.eup %412  ;;  %v163_v23 = vadd.f32 1.0, %v161_v19  ;;  %v215_v60 = vmul.f32 %v213_v52, %v611_v17  ;;  %v154_v17 = vmul.f32 0.5, %v578_v2  ;;  %v403_v2 = vld [vmem:[%s670_s5] ss:$0 sm:$0xff] }
 0x1a8   :  { %v165_v22 = vmul.f32 %v413_v21, %v162_v11  ;;  %vm170_vm8 = vweird.f32 %v413_v21 }
 0x1a9   :  { %414 = vrcp.f32 %v163_v23  ;;  %vm171_vm10 = vmor %vm169_vm9, %vm170_vm8  ;;  %v190_v41 = vand.u32 2147483648, %v163_v23  ;;  %v188_v44 = vand.u32 2147483647, %v163_v23  ;;  %vm184_vm13 = vweird.f32 %v163_v23 }
 0x1aa   :  { %v166_v25 = vsub.f32 1.0, %v165_v22  ;;  %416 = vpow2.f32 %v216_v49  ;;  %v218_v1 = vmul.f32 1.442695, %v215_v60 }
 0x1ab   :  { %v191_v48 = vor.u32 1.1754944e-38, %v190_v41  ;;  %vm189_vm15 = vcmp.eq.f32.partialorder %v188_v44, 8.507059e+37 }
 0x1ac   :  { %v167_v28 = vmul.f32 %v413_v21, %v166_v25  ;;  %418 = vpow2.f32 %v218_v1  ;;  %v405_v1 = vld [vmem:[%s674_s9] ss:$0 sm:$0xff]  ;;  %s365_s9 = sshll.u32 %s675_s10, 4  ;;  %s366_s9 = int_to_ptr.hbm [resolvable:$true] %s365_s9 }
 0x1ae   :  { %v168_v31 = vadd.f32 %v413_v21, %v167_v28 }
 0x1af   :  { %v415_v33 = vpop.eup %414 }
 0x1b0   :  { %v172_v34 = vsel %vm171_vm10, %v413_v21, %v168_v31  ;;  %v180_v36 = vmul.f32 %v415_v33, %v163_v23  ;;  %vm185_vm12 = vweird.f32 %v415_v33  ;;  %v417_v5 = vpop.eup %416 }
 0x1b1   :  { %v177_v37 = vsel %vm174_vm11, %v176_v32, %v172_v34  ;;  %vm186_vm14 = vmor %vm184_vm13, %vm185_vm12 }
 0x1b2   :  { %v194_v38 = vmul.f32 1.0614054, %v177_v37  ;;  %v181_v39 = vsub.f32 1.0, %v180_v36  ;;  %v419_v20 = vpop.eup %418 }
 0x1b4   :  { %v196_v40 = vadd.f32 -1.4531521, %v194_v38  ;;  %v182_v43 = vmul.f32 %v415_v33, %v181_v39 }
 0x1b6   :  { %v198_v45 = vmul.f32 %v196_v40, %v177_v37  ;;  %v183_v46 = vadd.f32 %v415_v33, %v182_v43 }
 0x1b8   :  { %v200_v47 = vadd.f32 1.4214138, %v198_v45  ;;  %v187_v50 = vsel %vm186_vm14, %v415_v33, %v183_v46  ;;  %v235_v33 = vld [vmem:[#allocation3 + $0x8] sm:$0xff] }
 0x1b9   :  { %v192_v54 = vsel %vm189_vm15, %v191_v48, %v187_v50 }
 0x1ba   :  { %v202_v53 = vmul.f32 %v200_v47, %v177_v37  ;;  %v195_v55 = vmul.f32 1.0614054, %v192_v54 }
 0x1bc   :  { %v204_v56 = vadd.f32 -0.28449672, %v202_v53  ;;  %v197_v59 = vadd.f32 -1.4531521, %v195_v55 }
 0x1be   :  { %v206_v61 = vmul.f32 %v204_v56, %v177_v37  ;;  %v199_v62 = vmul.f32 %v197_v59, %v192_v54 }
 0x1c0   :  { %v208_v63 = vadd.f32 0.2548296, %v206_v61  ;;  %v201_v0 = vadd.f32 1.4214138, %v199_v62  ;;  %v404_v62 = vld [vmem:[%s673_s8] ss:$0 sm:$0xff] }
 0x1c1   :  { %s452_s8 = smov [#allocation4]  }
 0x1c2   :  { %v210_v3 = vmul.f32 %v208_v63, %v177_v37  ;;  %v203_v6 = vmul.f32 %v201_v0, %v192_v54  ;;  %s363_s3 = sshll.u32 %s452_s8, 4  ;;  %s364_s3 = int_to_ptr.vmem [resolvable:$true] %s363_s3 }
 0x1c4   :  { %v220_v7 = vmul.f32 %v417_v5, %v210_v3  ;;  %v205_v8 = vadd.f32 -0.28449672, %v203_v6 }
 0x1c6   :  { %v222_v9 = vsub.f32 1.0, %v220_v7  ;;  %v207_v10 = vmul.f32 %v205_v8, %v192_v54 }
 0x1c8   :  { %v226_v11 = vsub.f32 0.0, %v222_v9  ;;  %v209_v13 = vadd.f32 0.2548296, %v207_v10 }
 0x1ca   :  { %v228_v16 = vsel %vm224_vm1, %v222_v9, %v226_v11  ;;  %v211_v19 = vmul.f32 %v209_v13, %v192_v54 }
 0x1cb   :  { %v230_v18 = vadd.f32 1.0, %v228_v16 }
 0x1cc   :  { %v221_v22 = vmul.f32 %v419_v20, %v211_v19 }
 0x1cd   :  { %v232_v21 = vmul.f32 %v230_v18, %v154_v17 }
 0x1ce   :  { %v223_v23 = vsub.f32 1.0, %v221_v22 }
 0x1cf   :  { %268 = vmatmul.f32.vlgmr.msra.gmra.mxu1 %v232_v21 }
 0x1d0   :  { %v227_v24 = vsub.f32 0.0, %v223_v23 }
 0x1d2   :  { %v229_v25 = vsel %vm225_vm2, %v223_v23, %v227_v24 }
 0x1d3   :  { %v231_v27 = vadd.f32 1.0, %v229_v25 }
 0x1d5   :  { %v233_v28 = vmul.f32 %v231_v27, %v155_v26 }
 0x1d7   :  { %271 = vmatmul.f32.vlgmr.msra.gmra.mxu2 %v233_v28 }
 0x24c   :  { %v269_v29 = vpop.f32.mrf.mxu1 }
 0x24d   :  { %v275_v30 = vadd.f32 %v269_v29, %v234_v4 }
 0x24f   :  { %277 = vst.msk [vmem:[#allocation3] sm:$0xff] %vm48_vm0, %v275_v30 }
 0x256   :  { %v282_v31 = vld [vmem:[#allocation3] sm:$0xff] }
 0x257   :  { %v288_v32 = vadd.f32 %v403_v2, %v282_v31 }
 0x259   :  { %v292_v15 = vadd.f32 %v288_v32, %v551_v57 }
 0x25a   :  { %v272_v34 = vpop.f32.mrf.mxu2 }
 0x25b   :  { %v296_v12 = vsel %vm48_vm0, %v292_v15, 0.0  ;;  %v276_v35 = vadd.f32 %v272_v34, %v235_v33 }
 0x25c   :  { %297 = vadd.xlane.f32.xlu2 %v296_v12 }
 0x25d   :  { %278 = vst.msk [vmem:[#allocation3 + $0x8] sm:$0xff] %vm48_vm0, %v276_v35 }
 0x264   :  { %v283_v36 = vld [vmem:[#allocation3 + $0x8] sm:$0xff] }
 0x265   :  { %v289_v37 = vadd.f32 %v403_v2, %v283_v36 }
 0x267   :  { %v293_v38 = vadd.f32 %v289_v37, %v556_v58 }
 0x269   :  { %v299_v39 = vsel %vm48_vm0, %v293_v38, 0.0 }
 0x26a   :  { %300 = vadd.xlane.f32.xlu2 %v299_v39 }
 0x2cf   :  { %v298_v40 = vpop.xlane.xlu2 %297 }
 0x2d0   :  { %v309_v41 = vmul.f32 %v298_v40, %v524_v14 }
 0x2d2   :  { %v311_v42 = vsub.f32 %v292_v15, %v309_v41 }
 0x2d4   :  { %v313_v43 = vmul.f32 %v311_v42, %v311_v42 }
 0x2d6   :  { %v315_v57 = vsel %vm48_vm0, %v313_v43, 0.0 }
 0x2d7   :  { %316 = vadd.xlane.f32.xlu0 %v315_v57 }
 0x2dd   :  { %v301_v44 = vpop.xlane.xlu2 %300 }
 0x2de   :  { %v310_v45 = vmul.f32 %v301_v44, %v524_v14 }
 0x2e0   :  { %v312_v46 = vsub.f32 %v293_v38, %v310_v45 }
 0x2e2   :  { %v314_v47 = vmul.f32 %v312_v46, %v312_v46 }
 0x2e4   :  { %v318_v48 = vsel %vm48_vm0, %v314_v47, 0.0 }
 0x2e5   :  { %319 = vadd.xlane.f32.xlu1 %v318_v48 }
 0x34a   :  { %v317_v58 = vpop.xlane.xlu0 %316 }
 0x34b   :  { %v321_v49 = vmul.f32 %v317_v58, %v524_v14 }
 0x34d   :  { %v323_v50 = vadd.f32 1e-05, %v321_v49 }
 0x34f   :  { %420 = vrsqrt.f32 %v323_v50  ;;  %vm331_vm4 = vweird.f32 %v323_v50 }
 0x355   :  { %v421_v51 = vpop.eup %420 }
 0x356   :  { %v326_v52 = vmul.f32 %v421_v51, %v323_v50  ;;  %vm332_vm3 = vweird.f32 %v421_v51 }
 0x357   :  { %vm333_vm5 = vmor %vm331_vm4, %vm332_vm3 }
 0x358   :  { %v327_v53 = vmul.f32 %v421_v51, %v326_v52  ;;  %v320_v54 = vpop.xlane.xlu1 %319 }
 0x359   :  { %v322_v56 = vmul.f32 %v320_v54, %v524_v14 }
 0x35a   :  { %v328_v55 = vmul.f32 0.5, %v327_v53 }
 0x35b   :  { %v324_v60 = vadd.f32 1e-05, %v322_v56 }
 0x35c   :  { %v329_v59 = vsub.f32 1.5, %v328_v55 }
 0x35d   :  { %422 = vrsqrt.f32 %v324_v60  ;;  %vm341_vm7 = vweird.f32 %v324_v60 }
 0x35e   :  { %v330_v61 = vmul.f32 %v421_v51, %v329_v59 }
 0x360   :  { %v334_v63 = vsel %vm333_vm5, %v421_v51, %v330_v61 }
 0x361   :  { %v345_v0 = vmul.f32 %v334_v63, %v311_v42 }
 0x363   :  { %v350_v3 = vmul.f32 %v404_v62, %v345_v0  ;;  %v423_v5 = vpop.eup %422 }
 0x364   :  { %v336_v14 = vmul.f32 %v423_v5, %v324_v60  ;;  %vm342_vm6 = vweird.f32 %v423_v5 }
 0x365   :  { %v355_v6 = vadd.f32 %v405_v1, %v350_v3  ;;  %vm343_vm8 = vmor %vm341_vm7, %vm342_vm6 }
 0x366   :  { %v337_v7 = vmul.f32 %v423_v5, %v336_v14 }
 0x367   :  { %357 = vst.msk [vmem:[#allocation4] sm:$0xff] %vm48_vm0, %v355_v6 }
 0x368   :  { %v338_v8 = vmul.f32 0.5, %v337_v7 }
 0x36a   :  { %v339_v9 = vsub.f32 1.5, %v338_v8 }
 0x36c   :  { %v340_v10 = vmul.f32 %v423_v5, %v339_v9 }
 0x36e   :  { %v344_v11 = vsel %vm343_vm8, %v423_v5, %v340_v10 }
 0x36f   :  { %v346_v13 = vmul.f32 %v344_v11, %v312_v46 }
 0x371   :  { %v351_v16 = vmul.f32 %v404_v62, %v346_v13 }
 0x373   :  { %v356_v17 = vadd.f32 %v405_v1, %v351_v16 }
 0x375   :  { %358 = vst.msk [vmem:[#allocation4 + $0x8] sm:$0xff] %vm48_vm0, %v356_v17 }
 0x376   :  { %371 = dma.vmem_to_hbm [thread:$0]  %s364_s3, 256, %s366_s9, [#allocation5], %s453_s1, %s453_s1, %s454_s21  }
 0x377   :  { %448 = dma.done.wait [#allocation5], 256  }
 0x378   :  { %449 = vsyncadd [#allocation5], 4294967040 }
 0x379   :  { %376 = vsyncpa [#allocation5], 1 }

</bundles_post_ra>
